<compile_context>
chip_gen: v7x
topology: tpu7x:2x2x1
jax: 0.10.0
libtpu: 0.0.40
codegen_flags: <defaults>
</compile_context>

<pallas_src>
import numpy as np
import jax
import jax.numpy as jnp
from jax.experimental import pallas as pl
from jax.experimental.pallas import tpu as pltpu

# Problem sizes (module fixes POOL=5, C_MID=128, HID=1024; the rest we pick small).
N, C_IN, H, W = 8, 4, 16, 16
NUM_CLASSES = 10
PAD_CLASSES = 128          # lane-dense padded class dim
POOL = 5
P2 = POOL * POOL           # 25
C_MID = 128
FEAT = C_MID * P2          # 5*5*128 = 3200
HID = 1024
BN_EPS = 1e-5


# ----------------------------------------------------------------------------- kernel
def _aux_kernel(xrow_ref, weff_ref, gb_ref, w2t_ref, b2_ref, out_ref):
    f32 = jnp.float32
    j = pl.program_id(0)

    # Fused pool + 1x1 conv + Linear(3200->1024): one bf16 MXU matmul per HID tile.
    # (Folded bias intentionally omitted: cancelled exactly by train-mode BN mean.)
    y1 = jnp.dot(xrow_ref[...], weff_ref[...], preferred_element_type=f32)   # (N, tn) f32

    # BatchNorm1d(1024), training mode: batch statistics, biased variance, eps=1e-5.
    # Stats are per-feature, so each HID column tile is independent.  Kept in f32.
    mean = jnp.mean(y1, axis=0, keepdims=True)
    var = jnp.mean((y1 - mean) ** 2, axis=0, keepdims=True)
    gb = gb_ref[...]                                   # (2, tn) f32: row0=gamma, row1=beta
    y1n = (y1 - mean) * jax.lax.rsqrt(var + BN_EPS) * gb[0:1, :] + gb[1:2, :]
    # TODO(synk): BatchNorm running_mean/running_var buffer updates (training-time
    # module-state side effect) are not materialized; only the forward output is produced.

    # Partial contribution of this HID tile to the final Linear(1024 -> num_classes),
    # computed on a lane-dense, zero-padded (tn, 128) bf16 weight tile.
    partial = jnp.dot(y1n.astype(jnp.bfloat16), w2t_ref[...],
                      preferred_element_type=f32)                            # (N, 128)

    @pl.when(j == 0)
    def _init():
        out_ref[...] = jnp.zeros_like(out_ref)

    out_ref[...] += partial

    @pl.when(j == pl.num_programs(0) - 1)
    def _finalize():
        out_ref[...] = out_ref[...] + b2_ref[...]


# ------------------------------------------------------------------- one-time weight prep
def _pool_matrix(in_size, out_size):
    """1-D adaptive-avg-pool averaging matrix (out_size, in_size), PyTorch bin rule."""
    m = np.zeros((out_size, in_size), np.float32)
    for i in range(out_size):
        s = (i * in_size) // out_size
        e = -((-(i + 1) * in_size) // out_size)   # ceil((i+1)*in/out)
        m[i, s:e] = 1.0 / (e - s)
    return m


def prepare_params(params, in_shape):
    """Fold pool + 1x1 conv + Linear(3200->1024) into W_eff; pack BN/linear2 params.

    Call ONCE per parameter set and cache the result; everything here is trace-time /
    one-off work that must not run on the per-forward hot path.

    Note: the folded bias (from conv bias + Linear1 bias) is NOT produced — train-mode
    BatchNorm subtracts the batch mean per feature, which cancels any per-feature
    constant bias exactly, so it is dead computation.
    """
    wc, bc, w1, b1, gamma, beta, w2, b2 = params
    del bc, b1                                                 # cancelled by BN mean
    _, c, h, w = in_shape

    ph = jnp.asarray(_pool_matrix(h, POOL))                    # (5, H)
    pw = jnp.asarray(_pool_matrix(w, POOL))                    # (5, W)
    w1r = w1.reshape(HID, C_MID, POOL, POOL)                   # (1024, 128, 5, 5)

    # W_eff[(c,h,w), k] = sum_{o,i,j} w1[k, o*25+i*5+j] * wc[o,c] * ph[i,h] * pw[j,w]
    t = jnp.einsum('koij,oc->kcij', w1r, wc)                   # (1024, C, 5, 5)
    t = jnp.einsum('kcij,ih->kchj', t, ph)                     # (1024, C, H, 5)
    t = jnp.einsum('kchj,jw->kchw', t, pw)                     # (1024, C, H, W)
    weff = t.reshape(HID, c * h * w).T                         # (C*H*W, 1024) f32

    # Pack per-feature BN affine params into one array (single small DMA per step).
    gb = jnp.stack([gamma, beta], axis=0).astype(jnp.float32)  # (2, HID)

    # Lane-dense padded second linear: (HID, 128) bf16, (1, 128) f32.
    w2t_pad = jnp.zeros((HID, PAD_CLASSES), jnp.float32).at[:, :NUM_CLASSES].set(w2.T)
    b2_pad = jnp.zeros((1, PAD_CLASSES), jnp.float32).at[0, :NUM_CLASSES].set(b2)

    return (weff.astype(jnp.bfloat16),                         # dominant weight in bf16
            gb,
            w2t_pad.astype(jnp.bfloat16),
            b2_pad)


# --------------------------------------------------------------------------- forward
def aux_classifier_forward(x, prepared, *, tn=512):
    """tn=512 -> 2 grid steps (good default everywhere); tn=1024 -> single step (v7x)."""
    weff, gb, w2t, b2 = prepared
    n, c, h, w = x.shape
    chw = c * h * w
    assert weff.shape == (chw, HID) and HID % tn == 0

    xrow = x.reshape(n, chw).astype(jnp.bfloat16)              # (N, C*H*W), tiny

    out = pl.pallas_call(
        _aux_kernel,
        out_shape=jax.ShapeDtypeStruct((n, PAD_CLASSES), jnp.float32),
        grid=(HID // tn,),
        in_specs=[
            pl.BlockSpec((n, chw), lambda j: (0, 0)),             # xrow (resident)
            pl.BlockSpec((chw, tn), lambda j: (0, j)),            # W_eff column tile (bf16)
            pl.BlockSpec((2, tn), lambda j: (0, j)),              # [gamma; beta] tile
            pl.BlockSpec((tn, PAD_CLASSES), lambda j: (j, 0)),    # w2^T row tile (bf16)
            pl.BlockSpec((1, PAD_CLASSES), lambda j: (0, 0)),     # b2 (resident)
        ],
        out_specs=pl.BlockSpec((n, PAD_CLASSES), lambda j: (0, 0)),  # resident accumulator
        compiler_params=pltpu.CompilerParams(
            dimension_semantics=("arbitrary",),                  # reduction over HID tiles
        ),
    )(xrow, weff, gb, w2t, b2)
    return out[:, :NUM_CLASSES]


# ----------------------------------------------------------------------- params / reference
def init_params(key):
    ks = jax.random.split(key, 8)
    wc = 0.1 * jax.random.normal(ks[0], (C_MID, C_IN), jnp.float32)       # Conv2d weight (1x1)
    bc = 0.1 * jax.random.normal(ks[1], (C_MID,), jnp.float32)            # Conv2d bias
    w1 = 0.02 * jax.random.normal(ks[2], (HID, FEAT), jnp.float32)        # Linear(3200,1024)
    b1 = 0.02 * jax.random.normal(ks[3], (HID,), jnp.float32)
    gamma = 1.0 + 0.1 * jax.random.normal(ks[4], (HID,), jnp.float32)     # BatchNorm1d weight
    beta = 0.1 * jax.random.normal(ks[5], (HID,), jnp.float32)            # BatchNorm1d bias
    w2 = 0.05 * jax.random.normal(ks[6], (NUM_CLASSES, HID), jnp.float32) # Linear(1024,classes)
    b2 = 0.05 * jax.random.normal(ks[7], (NUM_CLASSES,), jnp.float32)
    return (wc, bc, w1, b1, gamma, beta, w2, b2)


def reference_forward(x, params):
    """Plain-JAX reference mirroring the PyTorch forward (train-mode BatchNorm)."""
    wc, bc, w1, b1, gamma, beta, w2, b2 = params
    n, c, h, w = x.shape
    rows = []
    for i in range(POOL):
        hs, he = (i * h) // POOL, -((-(i + 1) * h) // POOL)
        cols = []
        for j in range(POOL):
            ws, we = (j * w) // POOL, -((-(j + 1) * w) // POOL)
            cols.append(jnp.mean(x[:, :, hs:he, ws:we], axis=(2, 3)))
        rows.append(jnp.stack(cols, axis=-1))
    pooled = jnp.stack(rows, axis=-2)                                     # (n, c, 5, 5)
    conv = jnp.einsum('oc,ncij->noij', wc, pooled) + bc[None, :, None, None]
    feat = conv.reshape(n, -1)
    y1 = feat @ w1.T + b1
    mean = y1.mean(axis=0)
    var = jnp.mean((y1 - mean) ** 2, axis=0)
    y1n = (y1 - mean) / jnp.sqrt(var + BN_EPS) * gamma + beta
    return y1n @ w2.T + b2


if __name__ == "__main__":
    key = jax.random.PRNGKey(0)
    kx, kp = jax.random.split(key)
    x = jax.random.normal(kx, (N, C_IN, H, W), jnp.float32)
    params = init_params(kp)

    # One-time fused-weight preparation (cache this across forward calls).
    prepared = jax.block_until_ready(prepare_params(params, x.shape))

    out = jax.block_until_ready(aux_classifier_forward(x, prepared))
    ref = jax.block_until_ready(reference_forward(x, params))

    assert out.shape == (N, NUM_CLASSES)
    if not np.allclose(np.asarray(out), np.asarray(ref), rtol=5e-2, atol=5e-2):
        raise AssertionError("Pallas kernel output does not match reference")
    print("KERNEL_OK")
</pallas_src>

<mosaic_0001>
module attributes {stable_mosaic.version = 11 : i64} {
  func.func @_aux_kernel(%arg0: i32, %arg1: memref<8x1024xbf16, #tpu.memory_space<vmem>>, %arg2: memref<1024x512xbf16, #tpu.memory_space<vmem>>, %arg3: memref<2x512xf32, #tpu.memory_space<vmem>>, %arg4: memref<512x128xbf16, #tpu.memory_space<vmem>>, %arg5: memref<1x128xf32, #tpu.memory_space<vmem>>, %arg6: memref<8x128xf32, #tpu.memory_space<vmem>>) attributes {dimension_semantics = [#tpu.dimension_semantics<arbitrary>], iteration_bounds = array<i64: 2>, scalar_prefetch = 0 : i64, scratch_operands = 0 : i64, tpu.core_type = #tpu.core_type<tc>, window_params = [{pipeline_mode = #tpu.pipeline_mode<synchronous>, transform_indices = @transform_0, window_bounds = array<i64: 8, 1024>}, {transform_indices = @transform_1, window_bounds = array<i64: 1024, 512>}, {transform_indices = @transform_2, window_bounds = array<i64: 2, 512>}, {transform_indices = @transform_3, window_bounds = array<i64: 512, 128>}, {pipeline_mode = #tpu.pipeline_mode<synchronous>, transform_indices = @transform_4, window_bounds = array<i64: 1, 128>}, {pipeline_mode = #tpu.pipeline_mode<synchronous>, transform_indices = @transform_5, window_bounds = array<i64: 8, 128>}]} {
    %c0 = arith.constant 0 : index
    %c0_0 = arith.constant 0 : index
    %0 = vector.load %arg1[%c0, %c0_0] : memref<8x1024xbf16, #tpu.memory_space<vmem>>, vector<8x1024xbf16>
    %c0_1 = arith.constant 0 : index
    %c0_2 = arith.constant 0 : index
    %1 = vector.load %arg2[%c0_1, %c0_2] : memref<1024x512xbf16, #tpu.memory_space<vmem>>, vector<1024x512xbf16>
    %cst = arith.constant dense<0.000000e+00> : vector<8x512xf32>
    %2 = tpu.matmul %0, %1, %cst {dimension_numbers = #tpu.dot_dimension_numbers<[1], [0], [0], [1], [0, 0, 1, 1], [], []>} : vector<8x1024xbf16>, vector<1024x512xbf16>, vector<8x512xf32> -> vector<8x512xf32>
    %cst_3 = arith.constant dense<0.000000e+00> : vector<512xf32>
    %3 = vector.multi_reduction <add>, %2, %cst_3 [0] : vector<8x512xf32> to vector<512xf32>
    %4 = vector.shape_cast %3 : vector<512xf32> to vector<1x512xf32>
    %cst_4 = arith.constant 8.000000e+00 : f32
    %5 = vector.broadcast %cst_4 : f32 to vector<1x512xf32>
    %6 = arith.divf %4, %5 : vector<1x512xf32>
    %7 = vector.broadcast %6 : vector<1x512xf32> to vector<8x512xf32>
    %8 = arith.subf %2, %7 : vector<8x512xf32>
    %9 = arith.mulf %8, %8 : vector<8x512xf32>
    %cst_5 = arith.constant dense<0.000000e+00> : vector<512xf32>
    %10 = vector.multi_reduction <add>, %9, %cst_5 [0] : vector<8x512xf32> to vector<512xf32>
    %11 = vector.shape_cast %10 : vector<512xf32> to vector<1x512xf32>
    %cst_6 = arith.constant 8.000000e+00 : f32
    %12 = vector.broadcast %cst_6 : f32 to vector<1x512xf32>
    %13 = arith.divf %11, %12 : vector<1x512xf32>
    %c0_7 = arith.constant 0 : index
    %c0_8 = arith.constant 0 : index
    %14 = vector.load %arg3[%c0_7, %c0_8] : memref<2x512xf32, #tpu.memory_space<vmem>>, vector<2x512xf32>
    %15 = vector.broadcast %6 : vector<1x512xf32> to vector<8x512xf32>
    %16 = arith.subf %2, %15 : vector<8x512xf32>
    %cst_9 = arith.constant 9.99999974E-6 : f32
    %17 = vector.broadcast %cst_9 : f32 to vector<1x512xf32>
    %18 = arith.addf %13, %17 : vector<1x512xf32>
    %19 = math.rsqrt %18 : vector<1x512xf32>
    %20 = vector.broadcast %19 : vector<1x512xf32> to vector<8x512xf32>
    %21 = arith.mulf %16, %20 : vector<8x512xf32>
    %22 = vector.extract_strided_slice %14 {offsets = [0, 0], sizes = [1, 512], strides = [1, 1]} : vector<2x512xf32> to vector<1x512xf32>
    %23 = vector.broadcast %22 : vector<1x512xf32> to vector<8x512xf32>
    %24 = arith.mulf %21, %23 : vector<8x512xf32>
    %25 = vector.extract_strided_slice %14 {offsets = [1, 0], sizes = [1, 512], strides = [1, 1]} : vector<2x512xf32> to vector<1x512xf32>
    %26 = vector.broadcast %25 : vector<1x512xf32> to vector<8x512xf32>
    %27 = arith.addf %24, %26 : vector<8x512xf32>
    %28 = arith.truncf %27 : vector<8x512xf32> to vector<8x512xbf16>
    %c0_10 = arith.constant 0 : index
    %c0_11 = arith.constant 0 : index
    %29 = vector.load %arg4[%c0_10, %c0_11] : memref<512x128xbf16, #tpu.memory_space<vmem>>, vector<512x128xbf16>
    %cst_12 = arith.constant dense<0.000000e+00> : vector<8x128xf32>
    %30 = tpu.matmul %28, %29, %cst_12 {dimension_numbers = #tpu.dot_dimension_numbers<[1], [0], [0], [1], [0, 0, 1, 1], [], []>} : vector<8x512xbf16>, vector<512x128xbf16>, vector<8x128xf32> -> vector<8x128xf32>
    %c0_i32 = arith.constant 0 : i32
    %31 = arith.cmpi eq, %arg0, %c0_i32 : i32
    %32 = arith.extui %31 : i1 to i32
    %c0_i32_13 = arith.constant 0 : i32
    %33 = arith.cmpi ne, %32, %c0_i32_13 : i32
    scf.if %33 {
      %cst_19 = arith.constant 0.000000e+00 : f32
      %40 = vector.broadcast %cst_19 : f32 to vector<8x128xf32>
      %c0_20 = arith.constant 0 : index
      %c0_21 = arith.constant 0 : index
      %41 = vector.load %arg6[%c0_20, %c0_21] : memref<8x128xf32, #tpu.memory_space<vmem>>, vector<8x128xf32>
      tpu.vector_store %arg6[%c0_20, %c0_21], %40 {strides = array<i32>} : memref<8x128xf32, #tpu.memory_space<vmem>>, vector<8x128xf32>,
    } else {
    }
    %c0_14 = arith.constant 0 : index
    %c0_15 = arith.constant 0 : index
    %34 = vector.load %arg6[%c0_14, %c0_15] : memref<8x128xf32, #tpu.memory_space<vmem>>, vector<8x128xf32>
    %35 = arith.addf %34, %30 : vector<8x128xf32>
    %c0_16 = arith.constant 0 : index
    %c0_17 = arith.constant 0 : index
    %36 = vector.load %arg6[%c0_16, %c0_17] : memref<8x128xf32, #tpu.memory_space<vmem>>, vector<8x128xf32>
    tpu.vector_store %arg6[%c0_16, %c0_17], %35 {strides = array<i32>} : memref<8x128xf32, #tpu.memory_space<vmem>>, vector<8x128xf32>,
    %c1_i32 = arith.constant 1 : i32
    %37 = arith.cmpi eq, %arg0, %c1_i32 : i32
    %38 = arith.extui %37 : i1 to i32
    %c0_i32_18 = arith.constant 0 : i32
    %39 = arith.cmpi ne, %38, %c0_i32_18 : i32
    scf.if %39 {
      %c0_19 = arith.constant 0 : index
      %c0_20 = arith.constant 0 : index
      %40 = vector.load %arg6[%c0_19, %c0_20] : memref<8x128xf32, #tpu.memory_space<vmem>>, vector<8x128xf32>
      %c0_21 = arith.constant 0 : index
      %c0_22 = arith.constant 0 : index
      %41 = vector.load %arg5[%c0_21, %c0_22] : memref<1x128xf32, #tpu.memory_space<vmem>>, vector<1x128xf32>
      %42 = vector.broadcast %41 : vector<1x128xf32> to vector<8x128xf32>
      %43 = arith.addf %40, %42 : vector<8x128xf32>
      %c0_23 = arith.constant 0 : index
      %c0_24 = arith.constant 0 : index
      %44 = vector.load %arg6[%c0_23, %c0_24] : memref<8x128xf32, #tpu.memory_space<vmem>>, vector<8x128xf32>
      tpu.vector_store %arg6[%c0_23, %c0_24], %43 {strides = array<i32>} : memref<8x128xf32, #tpu.memory_space<vmem>>, vector<8x128xf32>,
    } else {
    }
    return
  }
  func.func @transform_0(%arg0: i32) -> (i32, i32) {
    %c0_i32 = arith.constant 0 : i32
    %c0_i32_0 = arith.constant 0 : i32
    %c0_i32_1 = arith.constant 0 : i32
    return %c0_i32, %c0_i32_0 : i32, i32
  }
  func.func @transform_1(%arg0: i32) -> (i32, i32) {
    %c0_i32 = arith.constant 0 : i32
    %c0_i32_0 = arith.constant 0 : i32
    return %c0_i32, %arg0 : i32, i32
  }
  func.func @transform_2(%arg0: i32) -> (i32, i32) {
    %c0_i32 = arith.constant 0 : i32
    %c0_i32_0 = arith.constant 0 : i32
    return %c0_i32, %arg0 : i32, i32
  }
  func.func @transform_3(%arg0: i32) -> (i32, i32) {
    %c0_i32 = arith.constant 0 : i32
    %c0_i32_0 = arith.constant 0 : i32
    return %arg0, %c0_i32 : i32, i32
  }
  func.func @transform_4(%arg0: i32) -> (i32, i32) {
    %c0_i32 = arith.constant 0 : i32
    %c0_i32_0 = arith.constant 0 : i32
    %c0_i32_1 = arith.constant 0 : i32
    return %c0_i32, %c0_i32_0 : i32, i32
  }
  func.func @transform_5(%arg0: i32) -> (i32, i32) {
    %c0_i32 = arith.constant 0 : i32
    %c0_i32_0 = arith.constant 0 : i32
    %c0_i32_1 = arith.constant 0 : i32
    return %c0_i32, %c0_i32_0 : i32, i32
  }
}

</mosaic_0001>

<bundles_post_ra>
// kernel: tpu_custom_call.1
= control target key start
LH: loop header
LB: loop body
LE: loop exit
PB: predicated region body
PF: predicated region fallthrough
CT: control target
= control target key end

     0   :  { %s4647_s0 = inlined_call_operand.hbm [shape: bf16[8,1024], index: 0, kind: input, shape index: {}]   ;;  %s4648_s1 = inlined_call_operand.hbm [shape: bf16[1024,1024], index: 1, kind: input, shape index: {}]   ;;  %s4649_s2 = inlined_call_operand.hbm [shape: f32[2,1024], index: 2, kind: input, shape index: {}]   ;;  %s4650_s3 = inlined_call_operand.hbm [shape: bf16[1024,128], index: 3, kind: input, shape index: {}]   ;;  %s4651_s4 = inlined_call_operand.hbm [shape: f32[1,128], index: 4, kind: input, shape index: {}]   ;;  %s4652_s5 = inlined_call_operand.hbm [shape: f32[8,128], index: 5, kind: output, shape index: {}]  }
   0x1   :  { %4664 = sst [smem:[#allocation18_spill]] %s4648_s1 }
   0x2   :  { %4665 = sst [smem:[#allocation19_spill]] %s4651_s4 }
   0x3   :  { %10 = vsyncpa [#allocation3], 0 }
   0x4   :  { %11 = vsyncpa [#allocation6], 0 }
   0x5   :  { %13 = vsyncpa [#allocation6 + $0x1], 0 }
   0x6   :  { %14 = vsyncpa [#allocation9], 0 }
   0x7   :  { %16 = vsyncpa [#allocation9 + $0x1], 0 }
   0x8   :  { %17 = vsyncpa [#allocation4], 0  ;;  %s4048_s18 = smov 0   ;;  %s4050_s19 = smov 0  }
   0x9   :  { %s4052_s20 = smov 0   ;;  %s4054_s21 = smov 0  }
   0xa LB: > { %s4067_s22 = sadd.s32 4294967295, %s4004_s21   ;;  %s4070_s23 = sadd.s32 1, %s4004_s21   ;;  %s4004_s21 = sphi %s4054_s21, %s4693_s21   ;;  %s4000_s20 = sphi %s4052_s20, %s4692_s20   ;;  %s3996_s19 = sphi %s4050_s19, %s4691_s19   ;;  %s3992_s18 = sphi %s4048_s18, %s4690_s18  }
   0xb   : > { %s48_s24 = ssub.s32 %s4004_s21, %s4070_s23  ;;  %s51_s25 = sadd.s32 1, %s4000_s20 }
   0xc   : > { %p49_p0 = scmp.eq.s32.totalorder %s48_s24, 0  ;;  %p58_p1 = scmp.ne.s32.totalorder %s4000_s20, %s3996_s19 }
   0xd   : > { %p59_p2 = scmp.eq.s32.totalorder %s4004_s21, 0  ;;  %p64_p3 = scmp.ne.s32.totalorder %s3996_s19, %s3992_s18 }
   0xe   : > { %s4080_s26 = scalar_select %p49_p0, %s4000_s20, %s51_s25  }
   0xf   : > { %p4082_p4 = por %p59_p2, %p58_p1  ;;  %p4653_p5 = scmp.eq.s32.totalorder %s4067_s22, 0 }
  0x10   : > { %4666 = sst [smem:[#allocation17_spill]] %s4080_s26  ;;  %p2874_p6 = scmp.ge.s32.totalorder %s4004_s21, 1 }
  0x11   : > { %p169_p7 = scmp.lt.s32.totalorder %s4004_s21, 3  ;;  %p4091_p8 = por %p4653_p5, %p64_p3 }
  0x12   : > { %s4006_s30 = smov [#allocation10]   ;;  %p3304_p12 = scmp.lt.s32.totalorder %s4004_s21, 2 }
  0x13   : > { %s4668_s28 = scalar_select %p4091_p8, 1, 0 }
  0x14   : > { %p4096_p10 = pnand %p2874_p6, %p169_p7  ;;  %s193_s6 = sshll.u32 %s4006_s30, 4  ;;  %s194_s6 = int_to_ptr.vmem [resolvable:$true] %s193_s6 }
  0x15   : > { %s4660_s7 = sand.u32 1, %s4004_s21   ;;  %p4112_p0 = pnand %p3304_p12, %p4082_p4 }
  0x16   : > { %s4669_s29 = scalar_select %p4096_p10, 1, 0 }
  0x17   : > { %p3285_p11 = pneg %p4096_p10  ;;  %s4117_s10 = sand.u32 1, %s4000_s20  }
  0x18   : > { %s4671_s9 = scalar_select %p4112_p0, 1, 0 }
  0x19   : > { %p4106_p13 = pnand %p3285_p11, %p4653_p5  ;;  %s2878_s11 = sshll.u32 %s4117_s10, 11 }
  0x1a   : > { %s4672_s4 = sld [smem:[#allocation19_spill]] }
  0x1b   : > { %s4670_s8 = scalar_select %p4106_p13, 1, 0 }
  0x1c   : > { %p4657_p2 = pneg %p4106_p13 }
  0x20   : > { %s3782_s14 = scalar_lea.hbm %s4672_s4, 16 }
  0x21   : > { %p3783_p1 = scmp.ne.s32.totalorder %s4672_s4, %s3782_s14  ;;  %p3789_p6 = scmp.lt.u32.totalorder %s3782_s14, %s4672_s4 }
  0x23   : > { %p3785_p3 = pnand %p4657_p2, %p3783_p1 }
  0x25   : > { %p3786_p4 = pneg %p3785_p3 }
  0x27   : > { %p3791_p7 = pnand %p3789_p6, %p3786_p4 }
  0x29   : > { %3794 = shalt.err (!%p3791_p7)
}
  0x2a   : > { %s3795_s24 = scalar_lea.vmem %s194_s6, 16  ;;  %s3802_s25 = scalar_lea.vmem %s194_s6, 32 }
  0x2b   : > { %p3796_p11 = scmp.ne.s32.totalorder %s194_s6, %s3795_s24  ;;  %p3803_p5 = scmp.lt.s32.totalorder %s194_s6, %s194_s6 }
  0x2c   : > { %p3804_p8 = scmp.lt.s32.totalorder %s3802_s25, %s3795_s24 }
  0x2d   : > { %p3798_p12 = pnand %p3796_p11, %p4657_p2 }
  0x2e   : > { %p3805_p10 = por %p3804_p8, %p3803_p5 }
  0x2f   : > { %p3799_p9 = pneg %p3798_p12 }
  0x31   : > { %p3806_p0 = pnand %p3805_p10, %p3799_p9 }
  0x33   : > { %3809 = shalt.err (!%p3806_p0)
}
  0x34   : > { %3291 = dma.hbm_to_vmem [thread:$0]  (!%p4106_p13), %s4672_s4, 16, %s194_s6, [#allocation9]  }
  0x35   : > { %s3196_s12 = sshll.u32 %s4004_s21, 8  ;;  %s208_s13 = scalar_lea.vmem [#allocation5], %s2878_s11 }
  0x36   : > { %s215_s14 = sshll.u32 %s208_s13, 4  ;;  %s4673_s1 = sld [smem:[#allocation18_spill]]  ;;  %s4148_s14 = int_to_ptr.vmem [resolvable:$true] %s215_s14 }
  0x37   : > { %s4152_s18 = scalar_lea.sflag [#allocation6], %s4660_s7  ;;  %p4674_p8 = scmp.ne.s32.totalorder %s4671_s9, 0 }
  0x39   : > { %p4158_p9 = pneg %p4674_p8 }
  0x3b   : > { %s4675_s6 = scalar_select %p4158_p9, 1, 0 }
  0x3c   : > { %s4146_s17 = scalar_lea.hbm %s4673_s1, %s3196_s12  ;;  %s3815_s27 = scalar_lea.hbm %s4673_s1, 65536 }
  0x3d   : > { %s3810_s24 = scalar_lea.hbm %s4146_s17, 32768  ;;  %p3816_p1 = scmp.lt.u32.totalorder %s4146_s17, %s4673_s1 }
  0x3e   : > { %p3811_p5 = scmp.ne.s32.totalorder %s4146_s17, %s3810_s24  ;;  %p3817_p3 = scmp.lt.u32.totalorder %s3815_s27, %s3810_s24 }
  0x3f   : > { %p3819_p6 = scmp.lt.u32.totalorder %s3810_s24, %s4146_s17 }
  0x40   : > { %p3813_p10 = pnand %p4158_p9, %p3811_p5  ;;  %p3818_p4 = por %p3817_p3, %p3816_p1 }
  0x42   : > { %p3814_p0 = pneg %p3813_p10  ;;  %p3820_p7 = por %p3819_p6, %p3818_p4 }
  0x44   : > { %p3821_p11 = pnand %p3820_p7, %p3814_p0 }
  0x46   : > { %3824 = shalt.err (!%p3821_p11)
}
  0x47   : > { %s3825_s13 = scalar_lea.vmem %s4148_s14, 32768  ;;  %s4007_s15 = smov [#allocation5]  }
  0x48   : > { %p3826_p12 = scmp.ne.s32.totalorder %s4148_s14, %s3825_s13  ;;  %s3830_s16 = sshll.u32 %s4007_s15, 4  ;;  %s3831_s16 = int_to_ptr.vmem [resolvable:$false] %s3830_s16 }
  0x49   : > { %s3832_s11 = scalar_lea.vmem %s3831_s16, 65536  ;;  %p3833_p2 = scmp.lt.s32.totalorder %s4148_s14, %s3831_s16 }
  0x4a   : > { %p3828_p5 = pnand %p3826_p12, %p4158_p9  ;;  %p3834_p13 = scmp.lt.s32.totalorder %s3832_s11, %s3825_s13 }
  0x4c   : > { %p3829_p10 = pneg %p3828_p5  ;;  %p3835_p1 = por %p3834_p13, %p3833_p2 }
  0x4e   : > { %p3836_p3 = pnand %p3835_p1, %p3829_p10 }
  0x50   : > { %3839 = shalt.err (!%p3836_p3)
}
  0x51   : > { %s4008_s24 = smov 512   ;;  %s4009_s25 = smov 256  }
  0x52   : > { %s4010_s27 = smov 16   ;;  %s4011_s30 = smov [#allocation2]  }
  0x53   : > { %3295 = dma.hbm_to_vmem [thread:$0]  (!%p4674_p8), %s4146_s17, 32768, %s4148_s14, %s4152_s18, %s4008_s24, %s4009_s25, %s4010_s27  }
  0x54   : > { %s182_s12 = sshll.u32 %s4011_s30, 4  ;;  %s2881_s15 = sshll.u32 %s4117_s10, 3  ;;  %s183_s12 = int_to_ptr.vmem [resolvable:$true] %s182_s12 }
  0x55   : > { %s3840_s11 = scalar_lea.hbm %s4647_s0, 512  ;;  %p4676_p2 = scmp.ne.s32.totalorder %s4670_s8, 0 }
  0x56   : > { %p3841_p13 = scmp.ne.s32.totalorder %s4647_s0, %s3840_s11  ;;  %p3847_p7 = scmp.lt.u32.totalorder %s3840_s11, %s4647_s0 }
  0x57   : > { %p4677_p0 = pneg %p4676_p2 }
  0x59   : > { %p3843_p4 = pnand %p3841_p13, %p4677_p0 }
  0x5b   : > { %p3844_p6 = pneg %p3843_p4 }
  0x5d   : > { %p3849_p11 = pnand %p3847_p7, %p3844_p6 }
  0x5f   : > { %3852 = shalt.err (!%p3849_p11)
}
  0x60   : > { %s3853_s14 = scalar_lea.vmem %s183_s12, 512  ;;  %p4678_p5 = pmov %p4677_p0 }
  0x61   : > { %p3854_p12 = scmp.ne.s32.totalorder %s183_s12, %s3853_s14  ;;  %p3861_p3 = scmp.lt.s32.totalorder %s183_s12, %s183_s12 }
  0x62   : > { %p3862_p8 = scmp.lt.s32.totalorder %s3853_s14, %s3853_s14 }
  0x63   : > { %p3856_p10 = pnand %p3854_p12, %p4678_p5 }
  0x64   : > { %p3863_p9 = por %p3862_p8, %p3861_p3 }
  0x65   : > { %p3857_p1 = pneg %p3856_p10 }
  0x67   : > { %p3864_p0 = pnand %p3863_p9, %p3857_p1 }
  0x69   : > { %3867 = shalt.err (!%p3864_p0)
}
  0x6a   : > { %3288 = dma.hbm_to_vmem [thread:$0]  (!%p4676_p2), %s4647_s0, 512, %s183_s12, [#allocation3]  }
  0x6b   : > { %s3197_s4 = sshll.u32 %s4004_s21, 7  ;;  %s229_s26 = scalar_lea.vmem [#allocation7], %s2881_s15 }
  0x6c   : > { %s237_s17 = sshll.u32 %s229_s26, 4  ;;  %s235_s27 = scalar_lea.hbm %s4649_s2, %s3197_s4  ;;  %s238_s17 = int_to_ptr.vmem [resolvable:$true] %s237_s17 }
  0x6d   : > { %s3868_s30 = scalar_lea.hbm %s235_s27, 128  ;;  %p4679_p9 = scmp.ne.s32.totalorder %s4675_s6, 0 }
  0x6e   : > { %p3869_p8 = scmp.ne.s32.totalorder %s235_s27, %s3868_s30  ;;  %s3873_s13 = scalar_lea.hbm %s4649_s2, 256 }
  0x6f   : > { %p3874_p2 = scmp.lt.u32.totalorder %s235_s27, %s4649_s2  ;;  %p3875_p6 = scmp.lt.u32.totalorder %s3873_s13, %s3868_s30 }
  0x70   : > { %p3871_p13 = pnand %p3869_p8, %p4679_p9  ;;  %p3877_p11 = scmp.lt.u32.totalorder %s3868_s30, %s235_s27 }
  0x71   : > { %p3876_p7 = por %p3875_p6, %p3874_p2 }
  0x72   : > { %p3872_p4 = pneg %p3871_p13 }
  0x73   : > { %p3878_p12 = por %p3877_p11, %p3876_p7 }
  0x75   : > { %p3879_p5 = pnand %p3878_p12, %p3872_p4 }
  0x77   : > { %3882 = shalt.err (!%p3879_p5)
}
  0x78   : > { %s3883_s12 = scalar_lea.vmem %s238_s17, 128  ;;  %s4012_s15 = smov [#allocation7]  }
  0x79   : > { %p3884_p10 = scmp.ne.s32.totalorder %s238_s17, %s3883_s12  ;;  %s3888_s1 = sshll.u32 %s4012_s15, 4  ;;  %s3889_s1 = int_to_ptr.vmem [resolvable:$false] %s3888_s1 }
  0x7a   : > { %s3890_s7 = scalar_lea.vmem %s3889_s1, 256  ;;  %p3891_p0 = scmp.lt.s32.totalorder %s238_s17, %s3889_s1 }
  0x7b   : > { %p3886_p1 = pnand %p3884_p10, %p4679_p9  ;;  %p3892_p8 = scmp.lt.s32.totalorder %s3890_s7, %s3883_s12 }
  0x7d   : > { %p3887_p3 = pneg %p3886_p1  ;;  %p3893_p13 = por %p3892_p8, %p3891_p0 }
  0x7f   : > { %p3894_p2 = pnand %p3893_p13, %p3887_p3 }
  0x81   : > { %3897 = shalt.err (!%p3894_p2)
}
  0x82   : > { %p4680_p6 = scmp.ne.s32.totalorder %s4671_s9, 0  ;;  %s2884_s4 = sshll.u32 %s4117_s10, 8 }
  0x83   : > { %s3198_s26 = sshll.u32 %s4004_s21, 12  ;;  %s248_s8 = scalar_lea.vmem [#allocation8], %s2884_s4 }
  0x84   : > { %3298 = dma.hbm_to_vmem [thread:$0]  (!%p4680_p6), %s235_s27, 128, %s238_s17, %s4152_s18  }
  0x85   : > { %s4225_s30 = scalar_lea.hbm %s4650_s3, %s3198_s26  ;;  %s255_s16 = sshll.u32 %s248_s8, 4  ;;  %s4227_s16 = int_to_ptr.vmem [resolvable:$true] %s255_s16 }
  0x86   : > { %s4681_s13 = sand.u32 1, %s4004_s21   ;;  %s3898_s14 = scalar_lea.hbm %s4225_s30, 4096 }
  0x87   : > { %s4231_s11 = scalar_lea.sflag [#allocation9], %s4681_s13  ;;  %p3899_p4 = scmp.ne.s32.totalorder %s4225_s30, %s3898_s14 }
  0x88   : > { %s3903_s17 = scalar_lea.hbm %s4650_s3, 8192  ;;  %p3904_p12 = scmp.lt.u32.totalorder %s4225_s30, %s4650_s3 }
  0x89   : > { %p3901_p7 = pnand %p3899_p4, %p4679_p9  ;;  %p3905_p5 = scmp.lt.u32.totalorder %s3903_s17, %s3898_s14 }
  0x8a   : > { %p3907_p1 = scmp.lt.u32.totalorder %s3898_s14, %s4225_s30 }
  0x8b   : > { %p3902_p11 = pneg %p3901_p7  ;;  %p3906_p10 = por %p3905_p5, %p3904_p12 }
  0x8d   : > { %p3908_p3 = por %p3907_p1, %p3906_p10 }
  0x8f   : > { %p3909_p0 = pnand %p3908_p3, %p3902_p11 }
  0x91   : > { %3912 = shalt.err (!%p3909_p0)
}
  0x92   : > { %s3913_s21 = scalar_lea.vmem %s4227_s16, 4096  ;;  %s4013_s15 = smov [#allocation8]  }
  0x93   : > { %p3914_p8 = scmp.ne.s32.totalorder %s4227_s16, %s3913_s21  ;;  %s3918_s1 = sshll.u32 %s4013_s15, 4  ;;  %s3919_s1 = int_to_ptr.vmem [resolvable:$false] %s3918_s1 }
  0x94   : > { %s3920_s7 = scalar_lea.vmem %s3919_s1, 8192  ;;  %p3921_p4 = scmp.lt.s32.totalorder %s4227_s16, %s3919_s1 }
  0x95   : > { %p3916_p13 = pnand %p3914_p8, %p4679_p9  ;;  %p3922_p7 = scmp.lt.s32.totalorder %s3920_s7, %s3913_s21 }
  0x97   : > { %p3917_p2 = pneg %p3916_p13  ;;  %p3923_p12 = por %p3922_p7, %p3921_p4 }
  0x99   : > { %p3924_p5 = pnand %p3923_p12, %p3917_p2 }
  0x9b   : > { %3927 = shalt.err (!%p3924_p5)
}
  0x9c   : > { %s4014_s4 = smov 64   ;;  %s4015_s26 = smov 4  }
  0x9d   : > { %3301 = dma.hbm_to_vmem [thread:$0]  (!%p4680_p6), %s4225_s30, 4096, %s4227_s16, %s4231_s11, %s4014_s4, %s4014_s4, %s4015_s26  }
  0x9e   : > { %p4682_p9 = scmp.ne.s32.totalorder %s4669_s29, 0 }
  0x9f   : > { %p4683_p11 = scmp.eq.s32.totalorder (!%p4682_p9), %s4067_s22, 0 }
  0xa0   : > { %267 = sbr.rel (%p4682_p9) target bundleno = 961 (0x3c1), region = 40 }
  0xa7   : > { %3971 = dma.done.wait (%p4683_p11), [#allocation3], 512   ;;  %p4684_p10 = pmov %p4683_p11 }
  0xa8   : > { %s273_s6 = sand.u32 1, %s4067_s22   ;;  %s275_s24 = sand.u32 1, %s3996_s19  }
  0xa9   : > { %3973 = vsyncadd (%p4684_p10), [#allocation3], 4294966784  ;;  %s2889_s25 = sshll.u32 %s275_s24, 11  ;;  %s274_s8 = scalar_lea.sflag [#allocation6], %s273_s6 }
  0xaa   : > { %s4263_s13 = scalar_lea.vmem [#allocation5], %s2889_s25  ;;  %p4685_p1 = scmp.ne.s32.totalorder %s4668_s28, 0 }
  0xac   : > { %3975 = dma.done.wait (%p4685_p1), %s274_s8, 32896  }
  0xad   : > { %3977 = vsyncadd (%p4685_p1), %s274_s8, 4294934400  ;;  %s2890_s29 = sshll.u32 %s275_s24, 3  ;;  %s2891_s9 = sshll.u32 %s275_s24, 8 }
  0xae   : > { %s4269_s30 = scalar_lea.vmem [#allocation7], %s2890_s29  ;;  %s292_s16 = scalar_lea.sflag [#allocation9], %s273_s6 }
  0xaf   : > { %s4271_s11 = scalar_lea.vmem [#allocation8], %s2891_s9 }
  0xb0   : > { %3979 = dma.done.wait (%p4685_p1), %s292_s16, 4096  }
  0xb1   : > { %3981 = vsyncadd (%p4685_p1), %s292_s16, 4294963200  ;;  %p4686_p6 = pmov %p4684_p10 }
  0xb3   : > { %3983 = dma.done.wait (%p4686_p6), [#allocation9], 16   ;;  %p4687_p3 = pmov %p4686_p6 }
  0xb4   : > { %v3350_v0 = vld [vmem:[%s4263_s13 + $0x4] ss:$16 sps:$4 sm:$0xff]   ;;  %v3352_v1 = vld [vmem:[%s4263_s13 + $0xc] ss:$16 sps:$4 sm:$0xff]   ;;  %v3354_v2 = vld [vmem:[%s4263_s13] ss:$16 sps:$4 sm:$0xff]  }
  0xb5   : > { %3985 = vsyncadd (%p4687_p3), [#allocation9], 4294967280  ;;  %1903 = vmatprep.subr.bf16.mxu0 %v3350_v0  ;;  %v3355_v3 = vld [vmem:[%s4263_s13 + $0x8] ss:$16 sps:$4 sm:$0xff]   ;;  %2067 = vmatprep.subr.bf16.mxu1 %v3352_v1  ;;  %v3356_v4 = vld [vmem:[%s4263_s13 + $0x24] ss:$16 sps:$4 sm:$0xff]  }
  0xb6   : > { %1904 = vmatpush1.bf16.msra.mxu0 %v3354_v2  ;;  %2068 = vmatpush1.bf16.msra.mxu1 %v3355_v3  ;;  %v3358_v5 = vld [vmem:[%s4263_s13 + $0x2c] ss:$16 sps:$4 sm:$0xff]   ;;  %v3360_v6 = vld [vmem:[%s4263_s13 + $0x20] ss:$16 sps:$4 sm:$0xff]   ;;  %v3361_v7 = vld [vmem:[%s4263_s13 + $0x28] ss:$16 sps:$4 sm:$0xff]  }
  0xb7   : > { %1905 = vmatprep.subr.bf16.mxu0 %v3356_v4  ;;  %2069 = vmatprep.subr.bf16.mxu1 %v3358_v5  ;;  %v3362_v8 = vld [vmem:[%s4263_s13 + $0x44] ss:$16 sps:$4 sm:$0xff]   ;;  %v3364_v9 = vld [vmem:[%s4263_s13 + $0x4c] ss:$16 sps:$4 sm:$0xff]   ;;  %v3366_v10 = vld [vmem:[%s4263_s13 + $0x40] ss:$16 sps:$4 sm:$0xff]  }
  0xb8   : > { %v3367_v11 = vld [vmem:[%s4263_s13 + $0x48] ss:$16 sps:$4 sm:$0xff]   ;;  %v3368_v12 = vld [vmem:[%s4263_s13 + $0x64] ss:$16 sps:$4 sm:$0xff]   ;;  %v3370_v13 = vld [vmem:[%s4263_s13 + $0x6c] ss:$16 sps:$4 sm:$0xff]  }
  0xb9   : > { %v3372_v14 = vld [vmem:[%s4263_s13 + $0x60] ss:$16 sps:$4 sm:$0xff]   ;;  %v3373_v15 = vld [vmem:[%s4263_s13 + $0x68] ss:$16 sps:$4 sm:$0xff]   ;;  %v3374_v16 = vld [vmem:[%s4263_s13 + $0x84] ss:$16 sps:$4 sm:$0xff]  }
  0xba   : > { %1906 = vmatpush1.bf16.msra.mxu0 %v3360_v6  ;;  %2070 = vmatpush1.bf16.msra.mxu1 %v3361_v7  ;;  %v3376_v17 = vld [vmem:[%s4263_s13 + $0x8c] ss:$16 sps:$4 sm:$0xff]   ;;  %v3378_v18 = vld [vmem:[%s4263_s13 + $0x80] ss:$16 sps:$4 sm:$0xff]   ;;  %v3379_v19 = vld [vmem:[%s4263_s13 + $0x88] ss:$16 sps:$4 sm:$0xff]  }
  0xbb   : > { %1907 = vmatprep.subr.bf16.mxu0 %v3362_v8  ;;  %2071 = vmatprep.subr.bf16.mxu1 %v3364_v9  ;;  %v3380_v20 = vld [vmem:[%s4263_s13 + $0xa4] ss:$16 sps:$4 sm:$0xff]   ;;  %v3382_v21 = vld [vmem:[%s4263_s13 + $0xac] ss:$16 sps:$4 sm:$0xff]   ;;  %v3384_v22 = vld [vmem:[%s4263_s13 + $0xa0] ss:$16 sps:$4 sm:$0xff]  }
  0xbc   : > { %v3385_v23 = vld [vmem:[%s4263_s13 + $0xa8] ss:$16 sps:$4 sm:$0xff]   ;;  %v3386_v24 = vld [vmem:[%s4263_s13 + $0xc4] ss:$16 sps:$4 sm:$0xff]   ;;  %v3388_v25 = vld [vmem:[%s4263_s13 + $0xcc] ss:$16 sps:$4 sm:$0xff]  }
  0xbd   : > { %v3390_v26 = vld [vmem:[%s4263_s13 + $0xc0] ss:$16 sps:$4 sm:$0xff]   ;;  %v3391_v27 = vld [vmem:[%s4263_s13 + $0xc8] ss:$16 sps:$4 sm:$0xff]   ;;  %v3392_v28 = vld [vmem:[%s4263_s13 + $0xe4] ss:$16 sps:$4 sm:$0xff]  }
  0xbe   : > { %1908 = vmatpush1.bf16.msra.mxu0 %v3366_v10  ;;  %2072 = vmatpush1.bf16.msra.mxu1 %v3367_v11  ;;  %v3394_v29 = vld [vmem:[%s4263_s13 + $0xec] ss:$16 sps:$4 sm:$0xff]   ;;  %v3396_v30 = vld [vmem:[%s4263_s13 + $0xe0] ss:$16 sps:$4 sm:$0xff]   ;;  %v3397_v31 = vld [vmem:[%s4263_s13 + $0xe8] ss:$16 sps:$4 sm:$0xff]  }
  0xbf   : > { %1909 = vmatprep.subr.bf16.mxu0 %v3368_v12  ;;  %2073 = vmatprep.subr.bf16.mxu1 %v3370_v13  ;;  %v3398_v32 = vld [vmem:[%s4263_s13 + $0x104] ss:$16 sps:$4 sm:$0xff]   ;;  %v3400_v33 = vld [vmem:[%s4263_s13 + $0x10c] ss:$16 sps:$4 sm:$0xff]   ;;  %v3402_v34 = vld [vmem:[%s4263_s13 + $0x100] ss:$16 sps:$4 sm:$0xff]  }
  0xc0   : > { %v3403_v35 = vld [vmem:[%s4263_s13 + $0x108] ss:$16 sps:$4 sm:$0xff]   ;;  %v3404_v36 = vld [vmem:[%s4263_s13 + $0x124] ss:$16 sps:$4 sm:$0xff]   ;;  %v3406_v37 = vld [vmem:[%s4263_s13 + $0x12c] ss:$16 sps:$4 sm:$0xff]  }
  0xc1   : > { %v3408_v38 = vld [vmem:[%s4263_s13 + $0x120] ss:$16 sps:$4 sm:$0xff]   ;;  %v3409_v39 = vld [vmem:[%s4263_s13 + $0x128] ss:$16 sps:$4 sm:$0xff]   ;;  %v3410_v40 = vld [vmem:[%s4263_s13 + $0x144] ss:$16 sps:$4 sm:$0xff]  }
  0xc2   : > { %1910 = vmatpush1.bf16.msra.mxu0 %v3372_v14  ;;  %2074 = vmatpush1.bf16.msra.mxu1 %v3373_v15  ;;  %v3412_v41 = vld [vmem:[%s4263_s13 + $0x14c] ss:$16 sps:$4 sm:$0xff]   ;;  %v3414_v42 = vld [vmem:[%s4263_s13 + $0x140] ss:$16 sps:$4 sm:$0xff]   ;;  %v3415_v43 = vld [vmem:[%s4263_s13 + $0x148] ss:$16 sps:$4 sm:$0xff]  }
  0xc3   : > { %1911 = vmatprep.subr.bf16.mxu0 %v3374_v16  ;;  %2075 = vmatprep.subr.bf16.mxu1 %v3376_v17  ;;  %v3416_v44 = vld [vmem:[%s4263_s13 + $0x164] ss:$16 sps:$4 sm:$0xff]   ;;  %v3418_v45 = vld [vmem:[%s4263_s13 + $0x16c] ss:$16 sps:$4 sm:$0xff]   ;;  %v3420_v47 = vld [vmem:[%s4263_s13 + $0x160] ss:$16 sps:$4 sm:$0xff]  }
  0xc4   : > { %v335_v46 = vld [vmem:[#allocation2] sm:$0xff]  ;;  %v3421_v49 = vld [vmem:[%s4263_s13 + $0x168] ss:$16 sps:$4 sm:$0xff]   ;;  %v3424_v51 = vld [vmem:[%s4263_s13 + $0x18c] ss:$16 sps:$4 sm:$0xff]   ;;  %p4688_p0 = scmp.ne.s32.totalorder %s4067_s22, 0 }
  0xc5   : > { %v2894_v48 = vcombine.high %v335_v46, %v335_v46  ;;  %v3422_v50 = vld [vmem:[%s4263_s13 + $0x184] ss:$16 sps:$4 sm:$0xff]   ;;  %v3426_v52 = vld [vmem:[%s4263_s13 + $0x180] ss:$16 sps:$4 sm:$0xff]   ;;  %v3427_v53 = vld [vmem:[%s4263_s13 + $0x188] ss:$16 sps:$4 sm:$0xff]   ;;  %v2893_v4 = vcombine.low %v335_v46, %v335_v46 }
  0xc6   : > { %1912 = vmatpush1.bf16.msra.mxu0 %v3378_v18  ;;  %2076 = vmatpush1.bf16.msra.mxu1 %v3379_v19  ;;  %v3428_v54 = vld [vmem:[%s4263_s13 + $0x1a4] ss:$16 sps:$4 sm:$0xff]   ;;  %v3430_v55 = vld [vmem:[%s4263_s13 + $0x1ac] ss:$16 sps:$4 sm:$0xff]   ;;  %v3432_v56 = vld [vmem:[%s4263_s13 + $0x1a0] ss:$16 sps:$4 sm:$0xff]  }
  0xc7   : > { %1913 = vmatprep.subr.bf16.mxu0 %v3380_v20  ;;  %2077 = vmatprep.subr.bf16.mxu1 %v3382_v21  ;;  %v3433_v57 = vld [vmem:[%s4263_s13 + $0x1a8] ss:$16 sps:$4 sm:$0xff]   ;;  %v3434_v58 = vld [vmem:[%s4263_s13 + $0x1c4] ss:$16 sps:$4 sm:$0xff]   ;;  %v3436_v59 = vld [vmem:[%s4263_s13 + $0x1cc] ss:$16 sps:$4 sm:$0xff]  }
  0xc8   : > { %1935 = vmatprep.mubr.bf16.mxu0 %v2894_v48  ;;  %2099 = vmatprep.mubr.bf16.mxu1 %v2894_v48  ;;  %v3438_v60 = vld [vmem:[%s4263_s13 + $0x1c0] ss:$16 sps:$4 sm:$0xff]   ;;  %v3439_v61 = vld [vmem:[%s4263_s13 + $0x1c8] ss:$16 sps:$4 sm:$0xff]   ;;  %v3440_v62 = vld [vmem:[%s4263_s13 + $0x1e4] ss:$16 sps:$4 sm:$0xff]  }
  0xc9   : > { %v3442_v63 = vld [vmem:[%s4263_s13 + $0x1ec] ss:$16 sps:$4 sm:$0xff]   ;;  %v3444_v0 = vld [vmem:[%s4263_s13 + $0x1e0] ss:$16 sps:$4 sm:$0xff]   ;;  %v3445_v1 = vld [vmem:[%s4263_s13 + $0x1e8] ss:$16 sps:$4 sm:$0xff]  }
  0xca   : > { %1914 = vmatpush1.bf16.msra.mxu0 %v3384_v22  ;;  %2078 = vmatpush1.bf16.msra.mxu1 %v3385_v23  ;;  %v3450_v2 = vld [vmem:[%s4263_s13 + $0x204] ss:$16 sps:$4 sm:$0xff]   ;;  %v3453_v3 = vld [vmem:[%s4263_s13 + $0x20c] ss:$16 sps:$4 sm:$0xff]   ;;  %v3448_v5 = vld [vmem:[%s4263_s13 + $0x200] ss:$16 sps:$4 sm:$0xff]  }
  0xcb   : > { %1915 = vmatprep.subr.bf16.mxu0 %v3386_v24  ;;  %2079 = vmatprep.subr.bf16.mxu1 %v3388_v25  ;;  %v3451_v6 = vld [vmem:[%s4263_s13 + $0x208] ss:$16 sps:$4 sm:$0xff]   ;;  %v3456_v7 = vld [vmem:[%s4263_s13 + $0x224] ss:$16 sps:$4 sm:$0xff]   ;;  %v3459_v8 = vld [vmem:[%s4263_s13 + $0x22c] ss:$16 sps:$4 sm:$0xff]  }
  0xcc   : > { %v3454_v9 = vld [vmem:[%s4263_s13 + $0x220] ss:$16 sps:$4 sm:$0xff]   ;;  %v3457_v10 = vld [vmem:[%s4263_s13 + $0x228] ss:$16 sps:$4 sm:$0xff]   ;;  %v3462_v11 = vld [vmem:[%s4263_s13 + $0x244] ss:$16 sps:$4 sm:$0xff]  }
  0xcd   : > { %v3465_v12 = vld [vmem:[%s4263_s13 + $0x24c] ss:$16 sps:$4 sm:$0xff]   ;;  %v3460_v13 = vld [vmem:[%s4263_s13 + $0x240] ss:$16 sps:$4 sm:$0xff]   ;;  %v3463_v14 = vld [vmem:[%s4263_s13 + $0x248] ss:$16 sps:$4 sm:$0xff]  }
  0xce   : > { %1916 = vmatpush1.bf16.msra.mxu0 %v3390_v26  ;;  %2080 = vmatpush1.bf16.msra.mxu1 %v3391_v27  ;;  %v3468_v15 = vld [vmem:[%s4263_s13 + $0x264] ss:$16 sps:$4 sm:$0xff]   ;;  %v3471_v16 = vld [vmem:[%s4263_s13 + $0x26c] ss:$16 sps:$4 sm:$0xff]   ;;  %v3466_v17 = vld [vmem:[%s4263_s13 + $0x260] ss:$16 sps:$4 sm:$0xff]  }
  0xcf   : > { %1917 = vmatprep.subr.bf16.mxu0 %v3392_v28  ;;  %2081 = vmatprep.subr.bf16.mxu1 %v3394_v29  ;;  %v3469_v18 = vld [vmem:[%s4263_s13 + $0x268] ss:$16 sps:$4 sm:$0xff]   ;;  %v3474_v19 = vld [vmem:[%s4263_s13 + $0x284] ss:$16 sps:$4 sm:$0xff]   ;;  %v3477_v20 = vld [vmem:[%s4263_s13 + $0x28c] ss:$16 sps:$4 sm:$0xff]  }
  0xd0   : > { %v3472_v21 = vld [vmem:[%s4263_s13 + $0x280] ss:$16 sps:$4 sm:$0xff]   ;;  %v3475_v22 = vld [vmem:[%s4263_s13 + $0x288] ss:$16 sps:$4 sm:$0xff]   ;;  %v3480_v23 = vld [vmem:[%s4263_s13 + $0x2a4] ss:$16 sps:$4 sm:$0xff]  }
  0xd1   : > { %v3483_v24 = vld [vmem:[%s4263_s13 + $0x2ac] ss:$16 sps:$4 sm:$0xff]   ;;  %v3478_v25 = vld [vmem:[%s4263_s13 + $0x2a0] ss:$16 sps:$4 sm:$0xff]   ;;  %v3481_v26 = vld [vmem:[%s4263_s13 + $0x2a8] ss:$16 sps:$4 sm:$0xff]  }
  0xd2   : > { %1918 = vmatpush1.bf16.msra.mxu0 %v3396_v30  ;;  %2082 = vmatpush1.bf16.msra.mxu1 %v3397_v31  ;;  %v3486_v27 = vld [vmem:[%s4263_s13 + $0x2c4] ss:$16 sps:$4 sm:$0xff]   ;;  %v3489_v28 = vld [vmem:[%s4263_s13 + $0x2cc] ss:$16 sps:$4 sm:$0xff]   ;;  %v3484_v31 = vld [vmem:[%s4263_s13 + $0x2c0] ss:$16 sps:$4 sm:$0xff]  }
  0xd3   : > { %1919 = vmatprep.subr.bf16.mxu0 %v3398_v32  ;;  %2083 = vmatprep.subr.bf16.mxu1 %v3400_v33  ;;  %v4371_v29 = vld [vmem:[#allocation2 + $0x8] sm:$0xff]  ;;  %v3492_v33 = vld [vmem:[%s4263_s13 + $0x2e4] ss:$16 sps:$4 sm:$0xff]  }
  0xd4   : > { %v2896_v30 = vcombine.high %v4371_v29, %v4371_v29  ;;  %v3487_v32 = vld [vmem:[%s4263_s13 + $0x2c8] ss:$16 sps:$4 sm:$0xff]   ;;  %v3513_v46 = vld [vmem:[%s4263_s13 + $0x34c] ss:$16 sps:$4 sm:$0xff]  }
  0xd5   : > { %v3511_v48 = vld [vmem:[%s4263_s13 + $0x348] ss:$16 sps:$4 sm:$0xff]  }
  0xd6   : > { %1920 = vmatpush1.bf16.msra.mxu0 %v3402_v34  ;;  %2084 = vmatpush1.bf16.msra.mxu1 %v3403_v35  ;;  %v3495_v34 = vld [vmem:[%s4263_s13 + $0x2ec] ss:$16 sps:$4 sm:$0xff]   ;;  %v3490_v35 = vld [vmem:[%s4263_s13 + $0x2e0] ss:$16 sps:$4 sm:$0xff]  }
  0xd7   : > { %1921 = vmatprep.subr.bf16.mxu0 %v3404_v36  ;;  %2085 = vmatprep.subr.bf16.mxu1 %v3406_v37  ;;  %v3493_v36 = vld [vmem:[%s4263_s13 + $0x2e8] ss:$16 sps:$4 sm:$0xff]   ;;  %v3498_v37 = vld [vmem:[%s4263_s13 + $0x304] ss:$16 sps:$4 sm:$0xff]  }
  0xda   : > { %1922 = vmatpush1.bf16.msra.mxu0 %v3408_v38  ;;  %2086 = vmatpush1.bf16.msra.mxu1 %v3409_v39  ;;  %v3501_v38 = vld [vmem:[%s4263_s13 + $0x30c] ss:$16 sps:$4 sm:$0xff]   ;;  %v3496_v39 = vld [vmem:[%s4263_s13 + $0x300] ss:$16 sps:$4 sm:$0xff]  }
  0xdb   : > { %1923 = vmatprep.subr.bf16.mxu0 %v3410_v40  ;;  %2087 = vmatprep.subr.bf16.mxu1 %v3412_v41  ;;  %v3499_v40 = vld [vmem:[%s4263_s13 + $0x308] ss:$16 sps:$4 sm:$0xff]   ;;  %v3504_v41 = vld [vmem:[%s4263_s13 + $0x324] ss:$16 sps:$4 sm:$0xff]  }
  0xde   : > { %1924 = vmatpush1.bf16.msra.mxu0 %v3414_v42  ;;  %2088 = vmatpush1.bf16.msra.mxu1 %v3415_v43  ;;  %v3507_v42 = vld [vmem:[%s4263_s13 + $0x32c] ss:$16 sps:$4 sm:$0xff]   ;;  %v3502_v43 = vld [vmem:[%s4263_s13 + $0x320] ss:$16 sps:$4 sm:$0xff]  }
  0xdf   : > { %1925 = vmatprep.subr.bf16.mxu0 %v3416_v44  ;;  %2089 = vmatprep.subr.bf16.mxu1 %v3418_v45  ;;  %v3505_v44 = vld [vmem:[%s4263_s13 + $0x328] ss:$16 sps:$4 sm:$0xff]   ;;  %v3510_v45 = vld [vmem:[%s4263_s13 + $0x344] ss:$16 sps:$4 sm:$0xff]  }
  0xe2   : > { %1926 = vmatpush1.bf16.msra.mxu0 %v3420_v47  ;;  %2090 = vmatpush1.bf16.msra.mxu1 %v3421_v49  ;;  %v3508_v47 = vld [vmem:[%s4263_s13 + $0x340] ss:$16 sps:$4 sm:$0xff]   ;;  %v3516_v49 = vld [vmem:[%s4263_s13 + $0x364] ss:$16 sps:$4 sm:$0xff]  }
  0xe3   : > { %1927 = vmatprep.subr.bf16.mxu0 %v3422_v50  ;;  %2091 = vmatprep.subr.bf16.mxu1 %v3424_v51  ;;  %v3519_v50 = vld [vmem:[%s4263_s13 + $0x36c] ss:$16 sps:$4 sm:$0xff]   ;;  %v3514_v51 = vld [vmem:[%s4263_s13 + $0x360] ss:$16 sps:$4 sm:$0xff]  }
  0xe6   : > { %1928 = vmatpush1.bf16.msra.mxu0 %v3426_v52  ;;  %2092 = vmatpush1.bf16.msra.mxu1 %v3427_v53  ;;  %v3517_v52 = vld [vmem:[%s4263_s13 + $0x368] ss:$16 sps:$4 sm:$0xff]   ;;  %v3522_v53 = vld [vmem:[%s4263_s13 + $0x384] ss:$16 sps:$4 sm:$0xff]  }
  0xe7   : > { %1929 = vmatprep.subr.bf16.mxu0 %v3428_v54  ;;  %2093 = vmatprep.subr.bf16.mxu1 %v3430_v55  ;;  %v3525_v54 = vld [vmem:[%s4263_s13 + $0x38c] ss:$16 sps:$4 sm:$0xff]   ;;  %v3520_v55 = vld [vmem:[%s4263_s13 + $0x380] ss:$16 sps:$4 sm:$0xff]  }
  0xea   : > { %1930 = vmatpush1.bf16.msra.mxu0 %v3432_v56  ;;  %2094 = vmatpush1.bf16.msra.mxu1 %v3433_v57  ;;  %v3523_v56 = vld [vmem:[%s4263_s13 + $0x388] ss:$16 sps:$4 sm:$0xff]   ;;  %v3528_v57 = vld [vmem:[%s4263_s13 + $0x3a4] ss:$16 sps:$4 sm:$0xff]  }
  0xeb   : > { %1931 = vmatprep.subr.bf16.mxu0 %v3434_v58  ;;  %2095 = vmatprep.subr.bf16.mxu1 %v3436_v59  ;;  %v3531_v58 = vld [vmem:[%s4263_s13 + $0x3ac] ss:$16 sps:$4 sm:$0xff]   ;;  %v3526_v59 = vld [vmem:[%s4263_s13 + $0x3a0] ss:$16 sps:$4 sm:$0xff]  }
  0xee   : > { %1932 = vmatpush1.bf16.msra.mxu0 %v3438_v60  ;;  %2096 = vmatpush1.bf16.msra.mxu1 %v3439_v61  ;;  %v3529_v60 = vld [vmem:[%s4263_s13 + $0x3a8] ss:$16 sps:$4 sm:$0xff]   ;;  %v3534_v61 = vld [vmem:[%s4263_s13 + $0x3c4] ss:$16 sps:$4 sm:$0xff]  }
  0xef   : > { %1933 = vmatprep.subr.bf16.mxu0 %v3440_v62  ;;  %2097 = vmatprep.subr.bf16.mxu1 %v3442_v63  ;;  %v3537_v62 = vld [vmem:[%s4263_s13 + $0x3cc] ss:$16 sps:$4 sm:$0xff]   ;;  %v3532_v63 = vld [vmem:[%s4263_s13 + $0x3c0] ss:$16 sps:$4 sm:$0xff]  }
  0xf2   : > { %1934 = vmatpush1.bf16.msra.mxu0 %v3444_v0  ;;  %2098 = vmatpush1.bf16.msra.mxu1 %v3445_v1  ;;  %v3535_v0 = vld [vmem:[%s4263_s13 + $0x3c8] ss:$16 sps:$4 sm:$0xff]   ;;  %v3540_v1 = vld [vmem:[%s4263_s13 + $0x3e4] ss:$16 sps:$4 sm:$0xff]  }
  0xf3   : > { %1944 = vmatprep.subr.bf16.mxu0 %v3450_v2  ;;  %2108 = vmatprep.subr.bf16.mxu1 %v3453_v3  ;;  %v3543_v2 = vld [vmem:[%s4263_s13 + $0x3ec] ss:$16 sps:$4 sm:$0xff]   ;;  %v3538_v3 = vld [vmem:[%s4263_s13 + $0x3e0] ss:$16 sps:$4 sm:$0xff]  }
  0xf5   : > { %1936 = vmatmul.mubr.bf16.vlgmr.msra.gmra.mrb[0].mxu0 %v2893_v4  ;;  %2100 = vmatmul.mubr.bf16.vlgmr.msra.gmra.mrb[0].mxu1 %v2893_v4  ;;  %v3541_v4 = vld [vmem:[%s4263_s13 + $0x3e8] ss:$16 sps:$4 sm:$0xff]  }
  0xf6   : > { %1945 = vmatpush1.bf16.msra.mxu0 %v3448_v5  ;;  %2109 = vmatpush1.bf16.msra.mxu1 %v3451_v6  ;;  %v3548_v5 = vld [vmem:[%s4263_s13 + $0x404] ss:$16 sps:$4 sm:$0xff]   ;;  %v3551_v6 = vld [vmem:[%s4263_s13 + $0x40c] ss:$16 sps:$4 sm:$0xff]  }
  0xf7   : > { %1946 = vmatprep.subr.bf16.mxu0 %v3456_v7  ;;  %2110 = vmatprep.subr.bf16.mxu1 %v3459_v8  ;;  %v2895_v7 = vcombine.low %v4371_v29, %v4371_v29  ;;  %v3546_v8 = vld [vmem:[%s4263_s13 + $0x400] ss:$16 sps:$4 sm:$0xff]   ;;  %v3581_v29 = vld [vmem:[%s4263_s13 + $0x4ac] ss:$16 sps:$4 sm:$0xff]  }
  0xf8   : > { %1976 = vmatprep.mubr.bf16.mxu0 %v2896_v30  ;;  %2140 = vmatprep.mubr.bf16.mxu1 %v2896_v30  ;;  %v3576_v30 = vld [vmem:[%s4263_s13 + $0x4a0] ss:$16 sps:$4 sm:$0xff]  }
  0xfa   : > { %1947 = vmatpush1.bf16.msra.mxu0 %v3454_v9  ;;  %2111 = vmatpush1.bf16.msra.mxu1 %v3457_v10  ;;  %v3549_v9 = vld [vmem:[%s4263_s13 + $0x408] ss:$16 sps:$4 sm:$0xff]   ;;  %v3554_v10 = vld [vmem:[%s4263_s13 + $0x424] ss:$16 sps:$4 sm:$0xff]  }
  0xfb   : > { %1948 = vmatprep.subr.bf16.mxu0 %v3462_v11  ;;  %2112 = vmatprep.subr.bf16.mxu1 %v3465_v12  ;;  %v4420_v11 = vld [vmem:[#allocation2 + $0x10] sm:$0xff]  ;;  %v3557_v12 = vld [vmem:[%s4263_s13 + $0x42c] ss:$16 sps:$4 sm:$0xff]  }
  0xfe   : > { %1949 = vmatpush1.bf16.msra.mxu0 %v3460_v13  ;;  %2113 = vmatpush1.bf16.msra.mxu1 %v3463_v14  ;;  %v2898_v13 = vcombine.high %v4420_v11, %v4420_v11  ;;  %v3552_v14 = vld [vmem:[%s4263_s13 + $0x420] ss:$16 sps:$4 sm:$0xff]  }
  0xff   : > { %1950 = vmatprep.subr.bf16.mxu0 %v3468_v15  ;;  %2114 = vmatprep.subr.bf16.mxu1 %v3471_v16  ;;  %v3555_v15 = vld [vmem:[%s4263_s13 + $0x428] ss:$16 sps:$4 sm:$0xff]   ;;  %v3560_v16 = vld [vmem:[%s4263_s13 + $0x444] ss:$16 sps:$4 sm:$0xff]  }
 0x102   : > { %1951 = vmatpush1.bf16.msra.mxu0 %v3466_v17  ;;  %2115 = vmatpush1.bf16.msra.mxu1 %v3469_v18  ;;  %v3563_v17 = vld [vmem:[%s4263_s13 + $0x44c] ss:$16 sps:$4 sm:$0xff]   ;;  %v3558_v18 = vld [vmem:[%s4263_s13 + $0x440] ss:$16 sps:$4 sm:$0xff]  }
 0x103   : > { %1952 = vmatprep.subr.bf16.mxu0 %v3474_v19  ;;  %2116 = vmatprep.subr.bf16.mxu1 %v3477_v20  ;;  %v3561_v19 = vld [vmem:[%s4263_s13 + $0x448] ss:$16 sps:$4 sm:$0xff]   ;;  %v3566_v20 = vld [vmem:[%s4263_s13 + $0x464] ss:$16 sps:$4 sm:$0xff]  }
 0x106   : > { %1953 = vmatpush1.bf16.msra.mxu0 %v3472_v21  ;;  %2117 = vmatpush1.bf16.msra.mxu1 %v3475_v22  ;;  %v3569_v21 = vld [vmem:[%s4263_s13 + $0x46c] ss:$16 sps:$4 sm:$0xff]   ;;  %v3564_v22 = vld [vmem:[%s4263_s13 + $0x460] ss:$16 sps:$4 sm:$0xff]  }
 0x107   : > { %1954 = vmatprep.subr.bf16.mxu0 %v3480_v23  ;;  %2118 = vmatprep.subr.bf16.mxu1 %v3483_v24  ;;  %v3567_v23 = vld [vmem:[%s4263_s13 + $0x468] ss:$16 sps:$4 sm:$0xff]   ;;  %v3572_v24 = vld [vmem:[%s4263_s13 + $0x484] ss:$16 sps:$4 sm:$0xff]  }
 0x10a   : > { %1955 = vmatpush1.bf16.msra.mxu0 %v3478_v25  ;;  %2119 = vmatpush1.bf16.msra.mxu1 %v3481_v26  ;;  %v3575_v25 = vld [vmem:[%s4263_s13 + $0x48c] ss:$16 sps:$4 sm:$0xff]   ;;  %v3570_v26 = vld [vmem:[%s4263_s13 + $0x480] ss:$16 sps:$4 sm:$0xff]  }
 0x10b   : > { %1956 = vmatprep.subr.bf16.mxu0 %v3486_v27  ;;  %2120 = vmatprep.subr.bf16.mxu1 %v3489_v28  ;;  %v3573_v27 = vld [vmem:[%s4263_s13 + $0x488] ss:$16 sps:$4 sm:$0xff]   ;;  %v3578_v28 = vld [vmem:[%s4263_s13 + $0x4a4] ss:$16 sps:$4 sm:$0xff]  }
 0x10e   : > { %1957 = vmatpush1.bf16.msra.mxu0 %v3484_v31  ;;  %2121 = vmatpush1.bf16.msra.mxu1 %v3487_v32  ;;  %v3579_v31 = vld [vmem:[%s4263_s13 + $0x4a8] ss:$16 sps:$4 sm:$0xff]   ;;  %v3584_v32 = vld [vmem:[%s4263_s13 + $0x4c4] ss:$16 sps:$4 sm:$0xff]  }
 0x10f   : > { %1958 = vmatprep.subr.bf16.mxu0 %v3492_v33  ;;  %2122 = vmatprep.subr.bf16.mxu1 %v3495_v34  ;;  %v3587_v33 = vld [vmem:[%s4263_s13 + $0x4cc] ss:$16 sps:$4 sm:$0xff]   ;;  %v3582_v34 = vld [vmem:[%s4263_s13 + $0x4c0] ss:$16 sps:$4 sm:$0xff]  }
 0x112   : > { %1959 = vmatpush1.bf16.msra.mxu0 %v3490_v35  ;;  %2123 = vmatpush1.bf16.msra.mxu1 %v3493_v36  ;;  %v3585_v35 = vld [vmem:[%s4263_s13 + $0x4c8] ss:$16 sps:$4 sm:$0xff]   ;;  %v3590_v36 = vld [vmem:[%s4263_s13 + $0x4e4] ss:$16 sps:$4 sm:$0xff]  }
 0x113   : > { %1960 = vmatprep.subr.bf16.mxu0 %v3498_v37  ;;  %2124 = vmatprep.subr.bf16.mxu1 %v3501_v38  ;;  %v3593_v37 = vld [vmem:[%s4263_s13 + $0x4ec] ss:$16 sps:$4 sm:$0xff]   ;;  %v3588_v38 = vld [vmem:[%s4263_s13 + $0x4e0] ss:$16 sps:$4 sm:$0xff]  }
 0x116   : > { %1961 = vmatpush1.bf16.msra.mxu0 %v3496_v39  ;;  %2125 = vmatpush1.bf16.msra.mxu1 %v3499_v40  ;;  %v3591_v39 = vld [vmem:[%s4263_s13 + $0x4e8] ss:$16 sps:$4 sm:$0xff]   ;;  %v3596_v40 = vld [vmem:[%s4263_s13 + $0x504] ss:$16 sps:$4 sm:$0xff]  }
 0x117   : > { %1962 = vmatprep.subr.bf16.mxu0 %v3504_v41  ;;  %2126 = vmatprep.subr.bf16.mxu1 %v3507_v42  ;;  %v3599_v41 = vld [vmem:[%s4263_s13 + $0x50c] ss:$16 sps:$4 sm:$0xff]   ;;  %v3594_v42 = vld [vmem:[%s4263_s13 + $0x500] ss:$16 sps:$4 sm:$0xff]  }
 0x11a   : > { %1963 = vmatpush1.bf16.msra.mxu0 %v3502_v43  ;;  %2127 = vmatpush1.bf16.msra.mxu1 %v3505_v44  ;;  %v3597_v43 = vld [vmem:[%s4263_s13 + $0x508] ss:$16 sps:$4 sm:$0xff]   ;;  %v3602_v44 = vld [vmem:[%s4263_s13 + $0x524] ss:$16 sps:$4 sm:$0xff]  }
 0x11b   : > { %1964 = vmatprep.subr.bf16.mxu0 %v3510_v45  ;;  %2128 = vmatprep.subr.bf16.mxu1 %v3513_v46  ;;  %v3605_v45 = vld [vmem:[%s4263_s13 + $0x52c] ss:$16 sps:$4 sm:$0xff]   ;;  %v3600_v46 = vld [vmem:[%s4263_s13 + $0x520] ss:$16 sps:$4 sm:$0xff]  }
 0x11e   : > { %1965 = vmatpush1.bf16.msra.mxu0 %v3508_v47  ;;  %2129 = vmatpush1.bf16.msra.mxu1 %v3511_v48  ;;  %v3603_v47 = vld [vmem:[%s4263_s13 + $0x528] ss:$16 sps:$4 sm:$0xff]   ;;  %v3608_v48 = vld [vmem:[%s4263_s13 + $0x544] ss:$16 sps:$4 sm:$0xff]  }
 0x11f   : > { %1966 = vmatprep.subr.bf16.mxu0 %v3516_v49  ;;  %2130 = vmatprep.subr.bf16.mxu1 %v3519_v50  ;;  %v3611_v49 = vld [vmem:[%s4263_s13 + $0x54c] ss:$16 sps:$4 sm:$0xff]   ;;  %v3606_v50 = vld [vmem:[%s4263_s13 + $0x540] ss:$16 sps:$4 sm:$0xff]  }
 0x122   : > { %1967 = vmatpush1.bf16.msra.mxu0 %v3514_v51  ;;  %2131 = vmatpush1.bf16.msra.mxu1 %v3517_v52  ;;  %v3609_v51 = vld [vmem:[%s4263_s13 + $0x548] ss:$16 sps:$4 sm:$0xff]   ;;  %v3614_v52 = vld [vmem:[%s4263_s13 + $0x564] ss:$16 sps:$4 sm:$0xff]  }
 0x123   : > { %1968 = vmatprep.subr.bf16.mxu0 %v3522_v53  ;;  %2132 = vmatprep.subr.bf16.mxu1 %v3525_v54  ;;  %v3617_v53 = vld [vmem:[%s4263_s13 + $0x56c] ss:$16 sps:$4 sm:$0xff]   ;;  %v3612_v54 = vld [vmem:[%s4263_s13 + $0x560] ss:$16 sps:$4 sm:$0xff]  }
 0x126   : > { %1969 = vmatpush1.bf16.msra.mxu0 %v3520_v55  ;;  %2133 = vmatpush1.bf16.msra.mxu1 %v3523_v56  ;;  %v3615_v55 = vld [vmem:[%s4263_s13 + $0x568] ss:$16 sps:$4 sm:$0xff]   ;;  %v3620_v56 = vld [vmem:[%s4263_s13 + $0x584] ss:$16 sps:$4 sm:$0xff]  }
 0x127   : > { %1970 = vmatprep.subr.bf16.mxu0 %v3528_v57  ;;  %2134 = vmatprep.subr.bf16.mxu1 %v3531_v58  ;;  %v3623_v57 = vld [vmem:[%s4263_s13 + $0x58c] ss:$16 sps:$4 sm:$0xff]   ;;  %v3618_v58 = vld [vmem:[%s4263_s13 + $0x580] ss:$16 sps:$4 sm:$0xff]  }
 0x12a   : > { %1971 = vmatpush1.bf16.msra.mxu0 %v3526_v59  ;;  %2135 = vmatpush1.bf16.msra.mxu1 %v3529_v60  ;;  %v3621_v59 = vld [vmem:[%s4263_s13 + $0x588] ss:$16 sps:$4 sm:$0xff]   ;;  %v3626_v60 = vld [vmem:[%s4263_s13 + $0x5a4] ss:$16 sps:$4 sm:$0xff]  }
 0x12b   : > { %1972 = vmatprep.subr.bf16.mxu0 %v3534_v61  ;;  %2136 = vmatprep.subr.bf16.mxu1 %v3537_v62  ;;  %v3629_v61 = vld [vmem:[%s4263_s13 + $0x5ac] ss:$16 sps:$4 sm:$0xff]   ;;  %v3624_v62 = vld [vmem:[%s4263_s13 + $0x5a0] ss:$16 sps:$4 sm:$0xff]  }
 0x12e   : > { %1973 = vmatpush1.bf16.msra.mxu0 %v3532_v63  ;;  %2137 = vmatpush1.bf16.msra.mxu1 %v3535_v0  ;;  %v3627_v63 = vld [vmem:[%s4263_s13 + $0x5a8] ss:$16 sps:$4 sm:$0xff]   ;;  %v3632_v0 = vld [vmem:[%s4263_s13 + $0x5c4] ss:$16 sps:$4 sm:$0xff]  }
 0x12f   : > { %1974 = vmatprep.subr.bf16.mxu0 %v3540_v1  ;;  %2138 = vmatprep.subr.bf16.mxu1 %v3543_v2  ;;  %v3635_v1 = vld [vmem:[%s4263_s13 + $0x5cc] ss:$16 sps:$4 sm:$0xff]   ;;  %v3630_v2 = vld [vmem:[%s4263_s13 + $0x5c0] ss:$16 sps:$4 sm:$0xff]  }
 0x132   : > { %1975 = vmatpush1.bf16.msra.mxu0 %v3538_v3  ;;  %2139 = vmatpush1.bf16.msra.mxu1 %v3541_v4  ;;  %v3633_v3 = vld [vmem:[%s4263_s13 + $0x5c8] ss:$16 sps:$4 sm:$0xff]   ;;  %v3638_v4 = vld [vmem:[%s4263_s13 + $0x5e4] ss:$16 sps:$4 sm:$0xff]  }
 0x133   : > { %1985 = vmatprep.subr.bf16.mxu0 %v3548_v5  ;;  %2149 = vmatprep.subr.bf16.mxu1 %v3551_v6  ;;  %v3641_v5 = vld [vmem:[%s4263_s13 + $0x5ec] ss:$16 sps:$4 sm:$0xff]   ;;  %v3636_v6 = vld [vmem:[%s4263_s13 + $0x5e0] ss:$16 sps:$4 sm:$0xff]  }
 0x135   : > { %1977 = vmatmul.mubr.bf16.vlgmr.msra.gmra.mrb[0].mxu0 %v2895_v7  ;;  %2141 = vmatmul.mubr.bf16.vlgmr.msra.gmra.mrb[0].mxu1 %v2895_v7  ;;  %v3639_v7 = vld [vmem:[%s4263_s13 + $0x5e8] ss:$16 sps:$4 sm:$0xff]  }
 0x136   : > { %1986 = vmatpush1.bf16.msra.mxu0 %v3546_v8  ;;  %2150 = vmatpush1.bf16.msra.mxu1 %v3549_v9  ;;  %v3646_v8 = vld [vmem:[%s4263_s13 + $0x604] ss:$16 sps:$4 sm:$0xff]   ;;  %v3649_v9 = vld [vmem:[%s4263_s13 + $0x60c] ss:$16 sps:$4 sm:$0xff]  }
 0x137   : > { %1987 = vmatprep.subr.bf16.mxu0 %v3554_v10  ;;  %2151 = vmatprep.subr.bf16.mxu1 %v3557_v12  ;;  %v4485_v10 = vld [vmem:[#allocation2 + $0x18] sm:$0xff]  ;;  %v3644_v12 = vld [vmem:[%s4263_s13 + $0x600] ss:$16 sps:$4 sm:$0xff]  }
 0x138   : > { %2017 = vmatprep.mubr.bf16.mxu0 %v2898_v13  ;;  %2181 = vmatprep.mubr.bf16.mxu1 %v2898_v13  ;;  %v3647_v13 = vld [vmem:[%s4263_s13 + $0x608] ss:$16 sps:$4 sm:$0xff]  }
 0x13a   : > { %1988 = vmatpush1.bf16.msra.mxu0 %v3552_v14  ;;  %2152 = vmatpush1.bf16.msra.mxu1 %v3555_v15  ;;  %v2897_v14 = vcombine.low %v4420_v11, %v4420_v11  ;;  %v3652_v15 = vld [vmem:[%s4263_s13 + $0x624] ss:$16 sps:$4 sm:$0xff]   ;;  %v3650_v11 = vld [vmem:[%s4263_s13 + $0x620] ss:$16 sps:$4 sm:$0xff]  }
 0x13b   : > { %1989 = vmatprep.subr.bf16.mxu0 %v3560_v16  ;;  %2153 = vmatprep.subr.bf16.mxu1 %v3563_v17  ;;  %v3655_v16 = vld [vmem:[%s4263_s13 + $0x62c] ss:$16 sps:$4 sm:$0xff]   ;;  %v2900_v17 = vcombine.high %v4485_v10, %v4485_v10 }
 0x13e   : > { %1990 = vmatpush1.bf16.msra.mxu0 %v3558_v18  ;;  %2154 = vmatpush1.bf16.msra.mxu1 %v3561_v19  ;;  %v3653_v18 = vld [vmem:[%s4263_s13 + $0x628] ss:$16 sps:$4 sm:$0xff]   ;;  %v3658_v19 = vld [vmem:[%s4263_s13 + $0x644] ss:$16 sps:$4 sm:$0xff]  }
 0x13f   : > { %1991 = vmatprep.subr.bf16.mxu0 %v3566_v20  ;;  %2155 = vmatprep.subr.bf16.mxu1 %v3569_v21  ;;  %v3661_v20 = vld [vmem:[%s4263_s13 + $0x64c] ss:$16 sps:$4 sm:$0xff]   ;;  %v3656_v21 = vld [vmem:[%s4263_s13 + $0x640] ss:$16 sps:$4 sm:$0xff]  }
 0x142   : > { %1992 = vmatpush1.bf16.msra.mxu0 %v3564_v22  ;;  %2156 = vmatpush1.bf16.msra.mxu1 %v3567_v23  ;;  %v3659_v22 = vld [vmem:[%s4263_s13 + $0x648] ss:$16 sps:$4 sm:$0xff]   ;;  %v3664_v23 = vld [vmem:[%s4263_s13 + $0x664] ss:$16 sps:$4 sm:$0xff]  }
 0x143   : > { %1993 = vmatprep.subr.bf16.mxu0 %v3572_v24  ;;  %2157 = vmatprep.subr.bf16.mxu1 %v3575_v25  ;;  %v3667_v24 = vld [vmem:[%s4263_s13 + $0x66c] ss:$16 sps:$4 sm:$0xff]   ;;  %v3662_v25 = vld [vmem:[%s4263_s13 + $0x660] ss:$16 sps:$4 sm:$0xff]  }
 0x146   : > { %1994 = vmatpush1.bf16.msra.mxu0 %v3570_v26  ;;  %2158 = vmatpush1.bf16.msra.mxu1 %v3573_v27  ;;  %v3665_v26 = vld [vmem:[%s4263_s13 + $0x668] ss:$16 sps:$4 sm:$0xff]   ;;  %v3670_v27 = vld [vmem:[%s4263_s13 + $0x684] ss:$16 sps:$4 sm:$0xff]  }
 0x147   : > { %1995 = vmatprep.subr.bf16.mxu0 %v3578_v28  ;;  %2159 = vmatprep.subr.bf16.mxu1 %v3581_v29  ;;  %v3673_v28 = vld [vmem:[%s4263_s13 + $0x68c] ss:$16 sps:$4 sm:$0xff]   ;;  %v3668_v29 = vld [vmem:[%s4263_s13 + $0x680] ss:$16 sps:$4 sm:$0xff]  }
 0x14a   : > { %1996 = vmatpush1.bf16.msra.mxu0 %v3576_v30  ;;  %2160 = vmatpush1.bf16.msra.mxu1 %v3579_v31  ;;  %v3671_v30 = vld [vmem:[%s4263_s13 + $0x688] ss:$16 sps:$4 sm:$0xff]   ;;  %v3676_v31 = vld [vmem:[%s4263_s13 + $0x6a4] ss:$16 sps:$4 sm:$0xff]  }
 0x14b   : > { %1997 = vmatprep.subr.bf16.mxu0 %v3584_v32  ;;  %2161 = vmatprep.subr.bf16.mxu1 %v3587_v33  ;;  %v3679_v32 = vld [vmem:[%s4263_s13 + $0x6ac] ss:$16 sps:$4 sm:$0xff]   ;;  %v3674_v33 = vld [vmem:[%s4263_s13 + $0x6a0] ss:$16 sps:$4 sm:$0xff]  }
 0x14e   : > { %1998 = vmatpush1.bf16.msra.mxu0 %v3582_v34  ;;  %2162 = vmatpush1.bf16.msra.mxu1 %v3585_v35  ;;  %v3677_v34 = vld [vmem:[%s4263_s13 + $0x6a8] ss:$16 sps:$4 sm:$0xff]   ;;  %v3682_v35 = vld [vmem:[%s4263_s13 + $0x6c4] ss:$16 sps:$4 sm:$0xff]  }
 0x14f   : > { %1999 = vmatprep.subr.bf16.mxu0 %v3590_v36  ;;  %2163 = vmatprep.subr.bf16.mxu1 %v3593_v37  ;;  %v3685_v36 = vld [vmem:[%s4263_s13 + $0x6cc] ss:$16 sps:$4 sm:$0xff]   ;;  %v3680_v37 = vld [vmem:[%s4263_s13 + $0x6c0] ss:$16 sps:$4 sm:$0xff]  }
 0x152   : > { %2000 = vmatpush1.bf16.msra.mxu0 %v3588_v38  ;;  %2164 = vmatpush1.bf16.msra.mxu1 %v3591_v39  ;;  %v3683_v38 = vld [vmem:[%s4263_s13 + $0x6c8] ss:$16 sps:$4 sm:$0xff]   ;;  %v3688_v39 = vld [vmem:[%s4263_s13 + $0x6e4] ss:$16 sps:$4 sm:$0xff]  }
 0x153   : > { %2001 = vmatprep.subr.bf16.mxu0 %v3596_v40  ;;  %2165 = vmatprep.subr.bf16.mxu1 %v3599_v41  ;;  %v3691_v40 = vld [vmem:[%s4263_s13 + $0x6ec] ss:$16 sps:$4 sm:$0xff]   ;;  %v3686_v41 = vld [vmem:[%s4263_s13 + $0x6e0] ss:$16 sps:$4 sm:$0xff]  }
 0x156   : > { %2002 = vmatpush1.bf16.msra.mxu0 %v3594_v42  ;;  %2166 = vmatpush1.bf16.msra.mxu1 %v3597_v43  ;;  %v3689_v42 = vld [vmem:[%s4263_s13 + $0x6e8] ss:$16 sps:$4 sm:$0xff]   ;;  %v3694_v43 = vld [vmem:[%s4263_s13 + $0x704] ss:$16 sps:$4 sm:$0xff]  }
 0x157   : > { %2003 = vmatprep.subr.bf16.mxu0 %v3602_v44  ;;  %2167 = vmatprep.subr.bf16.mxu1 %v3605_v45  ;;  %v3697_v44 = vld [vmem:[%s4263_s13 + $0x70c] ss:$16 sps:$4 sm:$0xff]   ;;  %v3692_v45 = vld [vmem:[%s4263_s13 + $0x700] ss:$16 sps:$4 sm:$0xff]  }
 0x15a   : > { %2004 = vmatpush1.bf16.msra.mxu0 %v3600_v46  ;;  %2168 = vmatpush1.bf16.msra.mxu1 %v3603_v47  ;;  %v3695_v46 = vld [vmem:[%s4263_s13 + $0x708] ss:$16 sps:$4 sm:$0xff]   ;;  %v3700_v47 = vld [vmem:[%s4263_s13 + $0x724] ss:$16 sps:$4 sm:$0xff]  }
 0x15b   : > { %2005 = vmatprep.subr.bf16.mxu0 %v3608_v48  ;;  %2169 = vmatprep.subr.bf16.mxu1 %v3611_v49  ;;  %v3703_v48 = vld [vmem:[%s4263_s13 + $0x72c] ss:$16 sps:$4 sm:$0xff]   ;;  %v3698_v49 = vld [vmem:[%s4263_s13 + $0x720] ss:$16 sps:$4 sm:$0xff]  }
 0x15e   : > { %2006 = vmatpush1.bf16.msra.mxu0 %v3606_v50  ;;  %2170 = vmatpush1.bf16.msra.mxu1 %v3609_v51  ;;  %v3701_v50 = vld [vmem:[%s4263_s13 + $0x728] ss:$16 sps:$4 sm:$0xff]   ;;  %v3706_v51 = vld [vmem:[%s4263_s13 + $0x744] ss:$16 sps:$4 sm:$0xff]  }
 0x15f   : > { %2007 = vmatprep.subr.bf16.mxu0 %v3614_v52  ;;  %2171 = vmatprep.subr.bf16.mxu1 %v3617_v53  ;;  %v3709_v52 = vld [vmem:[%s4263_s13 + $0x74c] ss:$16 sps:$4 sm:$0xff]   ;;  %v3704_v53 = vld [vmem:[%s4263_s13 + $0x740] ss:$16 sps:$4 sm:$0xff]  }
 0x162   : > { %2008 = vmatpush1.bf16.msra.mxu0 %v3612_v54  ;;  %2172 = vmatpush1.bf16.msra.mxu1 %v3615_v55  ;;  %v3707_v54 = vld [vmem:[%s4263_s13 + $0x748] ss:$16 sps:$4 sm:$0xff]   ;;  %v3712_v55 = vld [vmem:[%s4263_s13 + $0x764] ss:$16 sps:$4 sm:$0xff]  }
 0x163   : > { %2009 = vmatprep.subr.bf16.mxu0 %v3620_v56  ;;  %2173 = vmatprep.subr.bf16.mxu1 %v3623_v57  ;;  %v3715_v56 = vld [vmem:[%s4263_s13 + $0x76c] ss:$16 sps:$4 sm:$0xff]   ;;  %v3710_v57 = vld [vmem:[%s4263_s13 + $0x760] ss:$16 sps:$4 sm:$0xff]  }
 0x166   : > { %2010 = vmatpush1.bf16.msra.mxu0 %v3618_v58  ;;  %2174 = vmatpush1.bf16.msra.mxu1 %v3621_v59  ;;  %v3713_v58 = vld [vmem:[%s4263_s13 + $0x768] ss:$16 sps:$4 sm:$0xff]   ;;  %v3718_v59 = vld [vmem:[%s4263_s13 + $0x784] ss:$16 sps:$4 sm:$0xff]  }
 0x167   : > { %2011 = vmatprep.subr.bf16.mxu0 %v3626_v60  ;;  %2175 = vmatprep.subr.bf16.mxu1 %v3629_v61  ;;  %v3721_v60 = vld [vmem:[%s4263_s13 + $0x78c] ss:$16 sps:$4 sm:$0xff]   ;;  %v3716_v61 = vld [vmem:[%s4263_s13 + $0x780] ss:$16 sps:$4 sm:$0xff]  }
 0x16a   : > { %2012 = vmatpush1.bf16.msra.mxu0 %v3624_v62  ;;  %2176 = vmatpush1.bf16.msra.mxu1 %v3627_v63  ;;  %v3719_v62 = vld [vmem:[%s4263_s13 + $0x788] ss:$16 sps:$4 sm:$0xff]   ;;  %v3724_v63 = vld [vmem:[%s4263_s13 + $0x7a4] ss:$16 sps:$4 sm:$0xff]  }
 0x16b   : > { %2013 = vmatprep.subr.bf16.mxu0 %v3632_v0  ;;  %2177 = vmatprep.subr.bf16.mxu1 %v3635_v1  ;;  %v3727_v0 = vld [vmem:[%s4263_s13 + $0x7ac] ss:$16 sps:$4 sm:$0xff]   ;;  %v3722_v1 = vld [vmem:[%s4263_s13 + $0x7a0] ss:$16 sps:$4 sm:$0xff]  }
 0x16e   : > { %2014 = vmatpush1.bf16.msra.mxu0 %v3630_v2  ;;  %2178 = vmatpush1.bf16.msra.mxu1 %v3633_v3  ;;  %v3725_v2 = vld [vmem:[%s4263_s13 + $0x7a8] ss:$16 sps:$4 sm:$0xff]   ;;  %v3730_v3 = vld [vmem:[%s4263_s13 + $0x7c4] ss:$16 sps:$4 sm:$0xff]  }
 0x16f   : > { %2015 = vmatprep.subr.bf16.mxu0 %v3638_v4  ;;  %2179 = vmatprep.subr.bf16.mxu1 %v3641_v5  ;;  %v3733_v4 = vld [vmem:[%s4263_s13 + $0x7cc] ss:$16 sps:$4 sm:$0xff]   ;;  %v3728_v5 = vld [vmem:[%s4263_s13 + $0x7c0] ss:$16 sps:$4 sm:$0xff]  }
 0x172   : > { %2016 = vmatpush1.bf16.msra.mxu0 %v3636_v6  ;;  %2180 = vmatpush1.bf16.msra.mxu1 %v3639_v7  ;;  %v3731_v6 = vld [vmem:[%s4263_s13 + $0x7c8] ss:$16 sps:$4 sm:$0xff]   ;;  %v3736_v7 = vld [vmem:[%s4263_s13 + $0x7e4] ss:$16 sps:$4 sm:$0xff]  }
 0x173   : > { %2026 = vmatprep.subr.bf16.mxu0 %v3646_v8  ;;  %2190 = vmatprep.subr.bf16.mxu1 %v3649_v9  ;;  %v3739_v8 = vld [vmem:[%s4263_s13 + $0x7ec] ss:$16 sps:$4 sm:$0xff]   ;;  %v3734_v9 = vld [vmem:[%s4263_s13 + $0x7e0] ss:$16 sps:$4 sm:$0xff]  }
 0x175   : > { %2018 = vmatmul.mubr.bf16.vlgmr.msra.gmra.mrb[0].mxu0 %v2897_v14  ;;  %2182 = vmatmul.mubr.bf16.vlgmr.msra.gmra.mrb[0].mxu1 %v2897_v14  ;;  %v3742_v14 = vld [vmem:[%s4271_s11 + $0x40] sm:$0xff]  }
 0x176   : > { %2027 = vmatpush1.bf16.msra.mxu0 %v3644_v12  ;;  %2191 = vmatpush1.bf16.msra.mxu1 %v3647_v13  ;;  %v3737_v12 = vld [vmem:[%s4263_s13 + $0x7e8] ss:$16 sps:$4 sm:$0xff]   ;;  %v2899_v13 = vcombine.low %v4485_v10, %v4485_v10 }
 0x177   : > { %2028 = vmatprep.subr.bf16.mxu0 %v3652_v15  ;;  %2192 = vmatprep.subr.bf16.mxu1 %v3655_v16  ;;  %v3743_v15 = vld [vmem:[%s4271_s11 + $0xc0] sm:$0xff]   ;;  %v3747_v10 = vld [vmem:[%s4271_s11 + $0xc8] sm:$0xff]  }
 0x178   : > { %2058 = vmatprep.mubr.bf16.mxu0 %v2900_v17  ;;  %2222 = vmatprep.mubr.bf16.mxu1 %v2900_v17  ;;  %v3744_v16 = vld [vmem:[%s4271_s11] sm:$0xff]  }
 0x179   : > { %v3745_v17 = vld [vmem:[%s4271_s11 + $0x80] sm:$0xff]  }
 0x17a   : > { %2029 = vmatpush1.bf16.msra.mxu0 %v3650_v11  ;;  %2193 = vmatpush1.bf16.msra.mxu1 %v3653_v18  ;;  %v3746_v11 = vld [vmem:[%s4271_s11 + $0x48] sm:$0xff]  }
 0x17b   : > { %2030 = vmatprep.subr.bf16.mxu0 %v3658_v19  ;;  %2194 = vmatprep.subr.bf16.mxu1 %v3661_v20  ;;  %v3748_v18 = vld [vmem:[%s4271_s11 + $0x8] sm:$0xff]   ;;  %v3750_v20 = vld [vmem:[%s4271_s11 + $0x50] sm:$0xff]  }
 0x17c   : > { %v3749_v19 = vld [vmem:[%s4271_s11 + $0x88] sm:$0xff]  }
 0x17e   : > { %2031 = vmatpush1.bf16.msra.mxu0 %v3656_v21  ;;  %2195 = vmatpush1.bf16.msra.mxu1 %v3659_v22  ;;  %v3751_v21 = vld [vmem:[%s4271_s11 + $0xd0] sm:$0xff]  }
 0x17f   : > { %2032 = vmatprep.subr.bf16.mxu0 %v3664_v23  ;;  %2196 = vmatprep.subr.bf16.mxu1 %v3667_v24  ;;  %v3752_v22 = vld [vmem:[%s4271_s11 + $0x10] sm:$0xff]   ;;  %v3754_v24 = vld [vmem:[%s4271_s11 + $0x58] sm:$0xff]  }
 0x180   : > { %v3753_v23 = vld [vmem:[%s4271_s11 + $0x90] sm:$0xff]  }
 0x182   : > { %2033 = vmatpush1.bf16.msra.mxu0 %v3662_v25  ;;  %2197 = vmatpush1.bf16.msra.mxu1 %v3665_v26  ;;  %v3755_v25 = vld [vmem:[%s4271_s11 + $0xd8] sm:$0xff]  }
 0x183   : > { %2034 = vmatprep.subr.bf16.mxu0 %v3670_v27  ;;  %2198 = vmatprep.subr.bf16.mxu1 %v3673_v28  ;;  %v3756_v26 = vld [vmem:[%s4271_s11 + $0x18] sm:$0xff]   ;;  %v3758_v28 = vld [vmem:[%s4271_s11 + $0x60] sm:$0xff]  }
 0x184   : > { %v3757_v27 = vld [vmem:[%s4271_s11 + $0x98] sm:$0xff]  }
 0x186   : > { %2035 = vmatpush1.bf16.msra.mxu0 %v3668_v29  ;;  %2199 = vmatpush1.bf16.msra.mxu1 %v3671_v30  ;;  %v3759_v29 = vld [vmem:[%s4271_s11 + $0xe0] sm:$0xff]  }
 0x187   : > { %2036 = vmatprep.subr.bf16.mxu0 %v3676_v31  ;;  %2200 = vmatprep.subr.bf16.mxu1 %v3679_v32  ;;  %v3760_v30 = vld [vmem:[%s4271_s11 + $0x20] sm:$0xff]   ;;  %v3762_v32 = vld [vmem:[%s4271_s11 + $0x68] sm:$0xff]  }
 0x188   : > { %v3761_v31 = vld [vmem:[%s4271_s11 + $0xa0] sm:$0xff]  }
 0x18a   : > { %2037 = vmatpush1.bf16.msra.mxu0 %v3674_v33  ;;  %2201 = vmatpush1.bf16.msra.mxu1 %v3677_v34  ;;  %v3763_v33 = vld [vmem:[%s4271_s11 + $0xe8] sm:$0xff]  }
 0x18b   : > { %2038 = vmatprep.subr.bf16.mxu0 %v3682_v35  ;;  %2202 = vmatprep.subr.bf16.mxu1 %v3685_v36  ;;  %v3764_v34 = vld [vmem:[%s4271_s11 + $0x28] sm:$0xff]   ;;  %v3766_v36 = vld [vmem:[%s4271_s11 + $0x70] sm:$0xff]  }
 0x18c   : > { %v3765_v35 = vld [vmem:[%s4271_s11 + $0xa8] sm:$0xff]  }
 0x18e   : > { %2039 = vmatpush1.bf16.msra.mxu0 %v3680_v37  ;;  %2203 = vmatpush1.bf16.msra.mxu1 %v3683_v38  ;;  %v3767_v37 = vld [vmem:[%s4271_s11 + $0xf0] sm:$0xff]  }
 0x18f   : > { %2040 = vmatprep.subr.bf16.mxu0 %v3688_v39  ;;  %2204 = vmatprep.subr.bf16.mxu1 %v3691_v40  ;;  %v3768_v38 = vld [vmem:[%s4271_s11 + $0x30] sm:$0xff]   ;;  %v3770_v40 = vld [vmem:[%s4271_s11 + $0x78] sm:$0xff]  }
 0x190   : > { %v3769_v39 = vld [vmem:[%s4271_s11 + $0xb0] sm:$0xff]  }
 0x192   : > { %2041 = vmatpush1.bf16.msra.mxu0 %v3686_v41  ;;  %2205 = vmatpush1.bf16.msra.mxu1 %v3689_v42  ;;  %v3771_v41 = vld [vmem:[%s4271_s11 + $0xf8] sm:$0xff]  }
 0x193   : > { %2042 = vmatprep.subr.bf16.mxu0 %v3694_v43  ;;  %2206 = vmatprep.subr.bf16.mxu1 %v3697_v44  ;;  %v3772_v42 = vld [vmem:[%s4271_s11 + $0x38] sm:$0xff]  }
 0x194   : > { %v3773_v43 = vld [vmem:[%s4271_s11 + $0xb8] sm:$0xff]  }
 0x196   : > { %2043 = vmatpush1.bf16.msra.mxu0 %v3692_v45  ;;  %2207 = vmatpush1.bf16.msra.mxu1 %v3695_v46 }
 0x197   : > { %2044 = vmatprep.subr.bf16.mxu0 %v3700_v47  ;;  %2208 = vmatprep.subr.bf16.mxu1 %v3703_v48 }
 0x19a   : > { %2045 = vmatpush1.bf16.msra.mxu0 %v3698_v49  ;;  %2209 = vmatpush1.bf16.msra.mxu1 %v3701_v50 }
 0x19b   : > { %2046 = vmatprep.subr.bf16.mxu0 %v3706_v51  ;;  %2210 = vmatprep.subr.bf16.mxu1 %v3709_v52 }
 0x19e   : > { %2047 = vmatpush1.bf16.msra.mxu0 %v3704_v53  ;;  %2211 = vmatpush1.bf16.msra.mxu1 %v3707_v54 }
 0x19f   : > { %2048 = vmatprep.subr.bf16.mxu0 %v3712_v55  ;;  %2212 = vmatprep.subr.bf16.mxu1 %v3715_v56 }
 0x1a2   : > { %2049 = vmatpush1.bf16.msra.mxu0 %v3710_v57  ;;  %2213 = vmatpush1.bf16.msra.mxu1 %v3713_v58 }
 0x1a3   : > { %2050 = vmatprep.subr.bf16.mxu0 %v3718_v59  ;;  %2214 = vmatprep.subr.bf16.mxu1 %v3721_v60 }
 0x1a6   : > { %2051 = vmatpush1.bf16.msra.mxu0 %v3716_v61  ;;  %2215 = vmatpush1.bf16.msra.mxu1 %v3719_v62 }
 0x1a7   : > { %2052 = vmatprep.subr.bf16.mxu0 %v3724_v63  ;;  %2216 = vmatprep.subr.bf16.mxu1 %v3727_v0 }
 0x1aa   : > { %2053 = vmatpush1.bf16.msra.mxu0 %v3722_v1  ;;  %2217 = vmatpush1.bf16.msra.mxu1 %v3725_v2 }
 0x1ab   : > { %2054 = vmatprep.subr.bf16.mxu0 %v3730_v3  ;;  %2218 = vmatprep.subr.bf16.mxu1 %v3733_v4 }
 0x1ae   : > { %2055 = vmatpush1.bf16.msra.mxu0 %v3728_v5  ;;  %2219 = vmatpush1.bf16.msra.mxu1 %v3731_v6 }
 0x1af   : > { %2056 = vmatprep.subr.bf16.mxu0 %v3736_v7  ;;  %2220 = vmatprep.subr.bf16.mxu1 %v3739_v8 }
 0x1b2   : > { %2057 = vmatpush1.bf16.msra.mxu0 %v3734_v9  ;;  %2221 = vmatpush1.bf16.msra.mxu1 %v3737_v12 }
 0x1b3   : > { %3199 = vmatprep.subr.bf16.mxu0 %v3742_v14  ;;  %3221 = vmatprep.subr.bf16.mxu1 %v3743_v15 }
 0x1b5   : > { %2059 = vmatmul.mubr.bf16.vlgmr.msra.gmra.mrb[0].mxu0 %v2899_v13  ;;  %2223 = vmatmul.mubr.bf16.vlgmr.msra.gmra.mrb[0].mxu1 %v2899_v13 }
 0x1b6   : > { %3200 = vmatpush3.bf16.msra.mxu0 %v3744_v16  ;;  %3222 = vmatpush3.bf16.msra.mxu1 %v3745_v17 }
 0x1b7   : > { %3201 = vmatprep.subr.bf16.mxu0 %v3746_v11  ;;  %3223 = vmatprep.subr.bf16.mxu1 %v3747_v10 }
 0x1ba   : > { %3202 = vmatpush3.bf16.msra.mxu0 %v3748_v18  ;;  %3224 = vmatpush3.bf16.msra.mxu1 %v3749_v19 }
 0x1bb   : > { %3203 = vmatprep.subr.bf16.mxu0 %v3750_v20  ;;  %3225 = vmatprep.subr.bf16.mxu1 %v3751_v21 }
 0x1be   : > { %3204 = vmatpush3.bf16.msra.mxu0 %v3752_v22  ;;  %3226 = vmatpush3.bf16.msra.mxu1 %v3753_v23 }
 0x1bf   : > { %3205 = vmatprep.subr.bf16.mxu0 %v3754_v24  ;;  %3227 = vmatprep.subr.bf16.mxu1 %v3755_v25 }
 0x1c2   : > { %3206 = vmatpush3.bf16.msra.mxu0 %v3756_v26  ;;  %3228 = vmatpush3.bf16.msra.mxu1 %v3757_v27 }
 0x1c3   : > { %3207 = vmatprep.subr.bf16.mxu0 %v3758_v28  ;;  %3229 = vmatprep.subr.bf16.mxu1 %v3759_v29 }
 0x1c6   : > { %3208 = vmatpush3.bf16.msra.mxu0 %v3760_v30  ;;  %3230 = vmatpush3.bf16.msra.mxu1 %v3761_v31 }
 0x1c7   : > { %3209 = vmatprep.subr.bf16.mxu0 %v3762_v32  ;;  %3231 = vmatprep.subr.bf16.mxu1 %v3763_v33 }
 0x1ca   : > { %3210 = vmatpush3.bf16.msra.mxu0 %v3764_v34  ;;  %3232 = vmatpush3.bf16.msra.mxu1 %v3765_v35 }
 0x1cb   : > { %3211 = vmatprep.subr.bf16.mxu0 %v3766_v36  ;;  %3233 = vmatprep.subr.bf16.mxu1 %v3767_v37 }
 0x1ce   : > { %3212 = vmatpush3.bf16.msra.mxu0 %v3768_v38  ;;  %3234 = vmatpush3.bf16.msra.mxu1 %v3769_v39 }
 0x1cf   : > { %3213 = vmatprep.subr.bf16.mxu0 %v3770_v40  ;;  %3235 = vmatprep.subr.bf16.mxu1 %v3771_v41 }
 0x1d2   : > { %3214 = vmatpush3.bf16.msra.mxu0 %v3772_v42  ;;  %3236 = vmatpush3.bf16.msra.mxu1 %v3773_v43  ;;  %v2310_v42 = vlaneseq }
 0x288   : > { %v2060_v44 = vpop.f32.mrb[0].mxu0  ;;  %v2224_v45 = vpop.f32.mrb[0].mxu1 }
 0x289   : > { %v2231_v46 = vrot.slane %v2060_v44, 4  ;;  %v2243_v47 = vrot.slane %v2224_v45, 4  ;;  %v2062_v48 = vpop.f32.mrb[1].mxu0  ;;  %v2226_v49 = vpop.f32.mrb[1].mxu1 }
 0x28a   : > { %v2237_v50 = vrot.slane %v2062_v48, 4  ;;  %v2249_v51 = vrot.slane %v2226_v49, 4  ;;  %v2064_v52 = vpop.f32.mrb[2].mxu0  ;;  %v2228_v53 = vpop.f32.mrb[2].mxu1 }
 0x28b   : > { %v2232_v54 = vadd.f32 %v2231_v46, %v2060_v44  ;;  %v2244_v55 = vadd.f32 %v2243_v47, %v2224_v45  ;;  %v2065_v56 = vpop.f32.mrb[3].mxu0  ;;  %v2229_v57 = vpop.f32.mrb[3].mxu1 }
 0x28c   : > { %v2238_v58 = vadd.f32 %v2237_v50, %v2062_v48  ;;  %v2250_v59 = vadd.f32 %v2249_v51, %v2226_v49  ;;  %v2311_v51 = vshrl.u32 %v2310_v42, 7 }
 0x28d   : > { %v2233_v60 = vrot.slane %v2232_v54, 2  ;;  %v2245_v61 = vrot.slane %v2244_v55, 2 }
 0x28e   : > { %v2239_v62 = vrot.slane %v2238_v58, 2  ;;  %v2251_v63 = vrot.slane %v2250_v59, 2 }
 0x28f   : > { %v2234_v0 = vadd.f32 %v2233_v60, %v2232_v54  ;;  %v2246_v1 = vadd.f32 %v2245_v61, %v2244_v55  ;;  %v2320_v60 = vsub.s32 4, %v2311_v51  ;;  %v2316_v61 = vsub.s32 2, %v2311_v51 }
 0x290   : > { %v2240_v2 = vadd.f32 %v2239_v62, %v2238_v58  ;;  %v2252_v3 = vadd.f32 %v2251_v63, %v2250_v59  ;;  %v2312_v58 = vsub.s32 0, %v2311_v51  ;;  %v2296_v59 = vld [vmem:[%s4269_s30] sm:$0xff]  ;;  %v2352_v62 = vsub.s32 1, %v2311_v51 }
 0x291   : > { %v2235_v4 = vrot.slane %v2234_v0, 1  ;;  %v2247_v5 = vrot.slane %v2246_v1, 1  ;;  %v2324_v63 = vsub.s32 6, %v2311_v51 }
 0x292   : > { %v2241_v6 = vrot.slane %v2240_v2, 1  ;;  %v2253_v7 = vrot.slane %v2252_v3, 1 }
 0x293   : > { %v2236_v8 = vadd.f32 %v2235_v4, %v2234_v0  ;;  %v2248_v9 = vadd.f32 %v2247_v5, %v2246_v1  ;;  %v2313_v0 = vrot.slane %v2296_v59, %v2312_v58  ;;  %v2356_v1 = vsub.s32 3, %v2311_v51 }
 0x294   : > { %v2242_v12 = vadd.f32 %v2241_v6, %v2240_v2  ;;  %v2254_v13 = vadd.f32 %v2253_v7, %v2252_v3  ;;  %v2360_v2 = vsub.s32 5, %v2311_v51  ;;  %v2321_v3 = vrot.slane %v2296_v59, %v2320_v60 }
 0x295   : > { %v2256_v14 = vmul.f32 0.125, %v2236_v8  ;;  %v2258_v15 = vmul.f32 0.125, %v2248_v9  ;;  %v2364_v4 = vsub.s32 7, %v2311_v51  ;;  %v2317_v5 = vrot.slane %v2296_v59, %v2316_v61 }
 0x296   : > { %v2257_v16 = vmul.f32 0.125, %v2242_v12  ;;  %v2259_v17 = vmul.f32 0.125, %v2254_v13  ;;  %v2325_v6 = vrot.slane %v2296_v59, %v2324_v63  ;;  %v2353_v7 = vrot.slane %v2296_v59, %v2352_v62 }
 0x297   : > { %v4587_v11 = vsub.f32 %v2060_v44, %v2256_v14  ;;  %v4589_v10 = vsub.f32 %v2224_v45, %v2258_v15  ;;  %v2333_v8 = vrot.slane %v2313_v0, %v2312_v58  ;;  %v2357_v9 = vrot.slane %v2296_v59, %v2356_v1 }
 0x298   : > { %v4591_v18 = vsub.f32 %v2062_v48, %v2257_v16  ;;  %v4593_v19 = vsub.f32 %v2226_v49, %v2259_v17  ;;  %v2361_v12 = vrot.slane %v2296_v59, %v2360_v2  ;;  %v2341_v14 = vrot.slane %v2321_v3, %v2312_v58 }
 0x299   : > { %v2264_v20 = vmul.f32 %v4587_v11, %v4587_v11  ;;  %v2266_v21 = vmul.f32 %v4589_v10, %v4589_v10  ;;  %v2365_v15 = vrot.slane %v2296_v59, %v2364_v4 }
 0x29a   : > { %v2265_v22 = vmul.f32 %v4591_v18, %v4591_v18  ;;  %v2267_v23 = vmul.f32 %v4593_v19, %v4593_v19 }
 0x29b   : > { %v2268_v24 = vrot.slane %v2264_v20, 4  ;;  %v2280_v25 = vrot.slane %v2266_v21, 4 }
 0x29c   : > { %v2274_v26 = vrot.slane %v2265_v22, 4  ;;  %v2286_v27 = vrot.slane %v2267_v23, 4 }
 0x29d   : > { %v2269_v28 = vadd.f32 %v2268_v24, %v2264_v20  ;;  %v2281_v29 = vadd.f32 %v2280_v25, %v2266_v21  ;;  %v2337_v20 = vrot.slane %v2317_v5, %v2312_v58  ;;  %v2373_v24 = vrot.slane %v2353_v7, %v2352_v62 }
 0x29e   : > { %v2275_v30 = vadd.f32 %v2274_v26, %v2265_v22  ;;  %v2287_v31 = vadd.f32 %v2286_v27, %v2267_v23  ;;  %v2345_v23 = vrot.slane %v2325_v6, %v2312_v58 }
 0x29f   : > { %v2270_v32 = vrot.slane %v2269_v28, 2  ;;  %v2282_v33 = vrot.slane %v2281_v29, 2 }
 0x2a0   : > { %v2276_v34 = vrot.slane %v2275_v30, 2  ;;  %v2288_v35 = vrot.slane %v2287_v31, 2 }
 0x2a1   : > { %v2271_v36 = vadd.f32 %v2270_v32, %v2269_v28  ;;  %v2283_v37 = vadd.f32 %v2282_v33, %v2281_v29  ;;  %v2377_v28 = vrot.slane %v2357_v9, %v2352_v62  ;;  %v2381_v29 = vrot.slane %v2361_v12, %v2352_v62 }
 0x2a2   : > { %v2277_v38 = vadd.f32 %v2276_v34, %v2275_v30  ;;  %v2289_v39 = vadd.f32 %v2288_v35, %v2287_v31  ;;  %v2385_v32 = vrot.slane %v2365_v15, %v2352_v62 }
 0x2a3   : > { %v2272_v40 = vrot.slane %v2271_v36, 1  ;;  %v2284_v41 = vrot.slane %v2283_v37, 1 }
 0x2a4   : > { %v2278_v43 = vrot.slane %v2277_v38, 1  ;;  %v2290_v44 = vrot.slane %v2289_v39, 1 }
 0x2a5   : > { %v2273_v45 = vadd.f32 %v2272_v40, %v2271_v36  ;;  %v2285_v46 = vadd.f32 %v2284_v41, %v2283_v37 }
 0x2a6   : > { %v2279_v47 = vadd.f32 %v2278_v43, %v2277_v38  ;;  %v2291_v48 = vadd.f32 %v2290_v44, %v2289_v39 }
 0x2a7   : > { %v2292_v49 = vmul.f32 0.125, %v2273_v45  ;;  %v2294_v50 = vmul.f32 0.125, %v2285_v46 }
 0x2a8   : > { %v2293_v52 = vmul.f32 0.125, %v2279_v47  ;;  %v2295_v53 = vmul.f32 0.125, %v2291_v48 }
 0x2a9   : > { %v2297_v54 = vadd.f32 1e-05, %v2292_v49  ;;  %v2299_v55 = vadd.f32 1e-05, %v2294_v50  ;;  %v4016_v50 = vmov (!%p4688_p0), 0.0  }
 0x2aa   : > { %v2298_v56 = vadd.f32 1e-05, %v2293_v52  ;;  %v2300_v57 = vadd.f32 1e-05, %v2295_v53  ;;  %2734 = vst [vmem:[#allocation11] sm:$0xff] (!%p4688_p0), %v4016_v50 }
 0x2ab   : > { %3774 = vrsqrt.f32 %v2297_v54 }
 0x2ac   : > { %3776 = vrsqrt.f32 %v2299_v55 }
 0x2ad   : > { %3778 = vrsqrt.f32 %v2298_v56 }
 0x2ae   : > { %3780 = vrsqrt.f32 %v2300_v57 }
 0x2b5   : > { %v3775_v13 = vpop.eup %3774 }
 0x2b6   : > { %v3777_v16 = vpop.eup %3776  ;;  %v2305_v17 = vmul.f32 %v3775_v13, %v4587_v11 }
 0x2b7   : > { %v3779_v21 = vpop.eup %3778  ;;  %v2307_v22 = vmul.f32 %v3777_v16, %v4589_v10 }
 0x2b8   : > { %v3781_v25 = vpop.eup %3780  ;;  %v2346_v26 = vmul.f32 %v2333_v8, %v2305_v17  ;;  %v2306_v27 = vmul.f32 %v3779_v21, %v4591_v18 }
 0x2b9   : > { %v2348_v30 = vmul.f32 %v2341_v14, %v2307_v22  ;;  %v2308_v31 = vmul.f32 %v3781_v25, %v4593_v19 }
 0x2ba   : > { %v2347_v33 = vmul.f32 %v2337_v20, %v2306_v27  ;;  %v2386_v35 = vadd.f32 %v2373_v24, %v2346_v26 }
 0x2bb   : > { %v2349_v34 = vmul.f32 %v2345_v23, %v2308_v31  ;;  %v2388_v36 = vadd.f32 %v2381_v29, %v2348_v30 }
 0x2bc   : > { %v2387_v11 = vadd.f32 %v2377_v28, %v2347_v33  ;;  %v2390_v39 = vpack.c.bf16 %v2386_v35, %v2386_v35 }
 0x2bd   : > { %v2389_v37 = vadd.f32 %v2385_v32, %v2349_v34  ;;  %v2392_v40 = vpack.c.bf16 %v2388_v36, %v2388_v36 }
 0x2be   : > { %v2391_v38 = vpack.c.bf16 %v2387_v11, %v2387_v11 }
 0x2bf   : > { %v2393_v10 = vpack.c.bf16 %v2389_v37, %v2389_v37 }
 0x2c0   : > { %2682 = vmatprep.mubr.bf16.mxu0 %v2391_v38 }
 0x2c1   : > { %2722 = vmatprep.mubr.bf16.mxu1 %v2393_v10  ;;  %2683 = vmatmul.mubr.bf16.vlgmr.msra.gmra.mrb[4].mxu0 %v2390_v39 }
 0x2c2   : > { %2723 = vmatmul.mubr.bf16.vlgmr.msra.gmra.mrb[4].mxu1 %v2392_v40 }
 0x393   : > { %2733 = sbr.rel (%p4688_p0) target bundleno = 922 (0x39a), region = 64 }
 0x394   : > { %v3215_v18 = vpop.f32.mrb[4].mxu0 }
 0x395   : > { %v3237_v41 = vpop.f32.mrb[4].mxu1  ;;  %v3216_v42 = vpop.f32.mrb[5].mxu0 }
 0x396   : > { %v3217_v43 = vadd.f32 %v3216_v42, %v3215_v18  ;;  %v3238_v19 = vpop.f32.mrb[5].mxu1  ;;  %v3218_v44 = vpop.f32.mrb[6].mxu0 }
 0x397   : > { %v3239_v45 = vadd.f32 %v3238_v19, %v3237_v41  ;;  %v3240_v46 = vpop.f32.mrb[6].mxu1  ;;  %v3219_v47 = vpop.f32.mrb[7].mxu0 }
 0x398   : > { %v3241_v48 = vpop.f32.mrb[7].mxu1 }
 0x399   : > { %v2725_v49 = vadd.f32 %v3239_v45, %v3217_v43 }
 0x39a PF: > { %v2735_v51 = vld [vmem:[#allocation11] sm:$0xff]  ;;  %p3190_p8 = scmp.ne.s32.totalorder %s4067_s22, 1 }
 0x39b   : > { %v2736_v52 = vadd.f32 %v2735_v51, %v2725_v49  ;;  %v3191_v54 = vld [vmem:[#allocation10] ss:$0 sm:$0xff] (!%p3190_p8) }
 0x39c   : > { %2741 = sbr.rel (%p3190_p8) target bundleno = 936 (0x3a8), region = 68 }
 0x39d   : > { %2737 = vst [vmem:[#allocation11] sm:$0xff] %v2736_v52 }
 0x3a4   : > { %v2742_v53 = vld [vmem:[#allocation11] sm:$0xff] }
 0x3a5   : > { %v2750_v55 = vadd.f32 %v3191_v54, %v2742_v53 }
 0x3a7   : > { %2751 = vst [vmem:[#allocation11] sm:$0xff] %v2750_v55 }
 0x3a8 PF: > { %p3307_p13 = scmp.eq.s32.totalorder %s4067_s22, 1  ;;  %s4017_s28 = smov [#allocation11]  }
 0x3a9   : > { %s2759_s14 = sshll.u32 %s4017_s28, 4  ;;  %s2760_s14 = int_to_ptr.vmem [resolvable:$true] %s2759_s14 }
 0x3aa   : > { %s3928_s10 = scalar_lea.vmem %s2760_s14, 128  ;;  %p3935_p12 = scmp.lt.s32.totalorder %s2760_s14, %s2760_s14 }
 0x3ab   : > { %p3929_p2 = scmp.ne.s32.totalorder %s2760_s14, %s3928_s10  ;;  %p3936_p5 = scmp.lt.s32.totalorder %s3928_s10, %s3928_s10 }
 0x3ad   : > { %p3930_p4 = pnand %p3929_p2, %p3307_p13  ;;  %p3937_p9 = por %p3936_p5, %p3935_p12 }
 0x3af   : > { %p3931_p7 = pneg %p3930_p4 }
 0x3b1   : > { %p3938_p11 = pnand %p3937_p9, %p3931_p7 }
 0x3b3   : > { %3941 = shalt.err (!%p3938_p11)
}
 0x3b4   : > { %s3942_s27 = scalar_lea.hbm %s4652_s5, 128 }
 0x3b5   : > { %p3943_p10 = scmp.ne.s32.totalorder %s4652_s5, %s3942_s27  ;;  %p3948_p3 = scmp.lt.u32.totalorder %s3942_s27, %s4652_s5 }
 0x3b7   : > { %p3944_p1 = pnand %p3943_p10, %p3307_p13 }
 0x3b9   : > { %p3945_p6 = pneg %p3944_p1 }
 0x3bb   : > { %p3950_p0 = pnand %p3948_p3, %p3945_p6 }
 0x3bd   : > { %3953 = shalt.err (!%p3950_p0)
}
 0x3be   : > { %3282 = dma.vmem_to_hbm [thread:$0]  (%p3307_p13), %s2760_s14, 128, %s4652_s5, [#allocation4]  }
 0x3bf   : > { %3987 = dma.done.wait (%p3307_p13), [#allocation4], 128  }
 0x3c0   : > { %3989 = vsyncadd (%p3307_p13), [#allocation4], 4294967168 }
 0x3c1 PF: > { %s4689_s26 = sld [smem:[#allocation17_spill]]  ;;  %p20_p8 = scmp.ge.s32.totalorder %s4070_s23, 4  }
 0x3c2   : > { %s4690_s18 = smov %s3996_s19  ;;  %s4691_s19 = smov %s4000_s20 }
 0x3c3   : > { %s4693_s21 = smov %s4070_s23  ;;  %22 = sbr.rel (!%p20_p8) target bundleno = 10 (0xa), region = 118 }
 0x3c7   : > { %s4692_s20 = smov %s4689_s26 }
 0x3ca   :  { %2772 = vsyncpa [#allocation3], 1 }
 0x3cb   :  { %2774 = vsyncpa [#allocation3 + $0x1], 1 }
 0x3cc   :  { %2775 = vsyncpa [#allocation6], 1 }
 0x3cd   :  { %2777 = vsyncpa [#allocation6 + $0x1], 1 }
 0x3ce   :  { %2778 = vsyncpa [#allocation9], 1 }
 0x3cf   :  { %2780 = vsyncpa [#allocation9 + $0x1], 1 }
 0x3d0   :  { %2781 = vsyncpa [#allocation4], 1 }
 0x3d1   :  { %2783 = vsyncpa [#allocation4 + $0x1], 1 }

</bundles_post_ra>
